<compile_context>
chip_gen: v5e
topology: v5e:2x2
jax: 0.10.0
libtpu: 0.0.40
codegen_flags: <defaults>
</compile_context>

<pallas_src>
import jax
import jax.numpy as jnp
from jax.experimental import pallas as pl
from jax.experimental.pallas import tpu as pltpu

IN_F, HID_F, OUT_F = 512, 256, 128


def _mlp_kernel(x_ref, w1_ref, b1_ref, w2_ref, b2_ref, o_ref):
    # fc1 + ReLU: bf16 x bf16 matmul on the MXU, f32 accumulate; bias/ReLU in f32.
    h = jnp.dot(x_ref[...], w1_ref[...], preferred_element_type=jnp.float32)
    h = jnp.maximum(h + b1_ref[...], 0.0)
    # fc2 + ReLU: cast the activation to the weight dtype (bf16) for the MXU,
    # keep f32 accumulation. (Deliberate mixed-precision choice.)
    y = jnp.dot(h.astype(w2_ref.dtype), w2_ref[...],
                preferred_element_type=jnp.float32)
    y = jnp.maximum(y + b2_ref[...], 0.0)
    o_ref[...] = y.astype(o_ref.dtype)


def fc_layer_forward(x, w1, b1, w2, b2, *, tm=256, compute_dtype=jnp.bfloat16):
    """Fused relu(fc2(relu(fc1(x)))).

    x: (B, 512); w1: (512, 256); b1: (256,); w2: (256, 128); b2: (128,).
    Weights are stored transposed vs. PyTorch (in_features, out_features).
    """
    B = x.shape[0]
    out_dtype = x.dtype

    # Cast streaming operands to the MXU compute dtype; biases stay f32.
    xc = x.astype(compute_dtype)
    w1c = w1.astype(compute_dtype)
    w2c = w2.astype(compute_dtype)
    b1_2d = b1.astype(jnp.float32).reshape(1, HID_F)
    b2_2d = b2.astype(jnp.float32).reshape(1, OUT_F)

    # Ragged batch handling: pad up to a multiple of the (large) batch tile.
    num_tiles = pl.cdiv(B, tm)
    b_pad = num_tiles * tm
    if b_pad != B:
        xc = jnp.pad(xc, ((0, b_pad - B), (0, 0)))

    in_bytes = jnp.dtype(compute_dtype).itemsize
    out_bytes = jnp.dtype(out_dtype).itemsize
    cost = pl.CostEstimate(
        flops=2 * b_pad * (IN_F * HID_F + HID_F * OUT_F),
        transcendentals=0,
        bytes_accessed=(b_pad * IN_F * in_bytes                     # x
                        + (IN_F * HID_F + HID_F * OUT_F) * in_bytes  # weights
                        + (HID_F + OUT_F) * 4                        # biases
                        + b_pad * OUT_F * out_bytes),                # output
    )

    out = pl.pallas_call(
        _mlp_kernel,
        out_shape=jax.ShapeDtypeStruct((b_pad, OUT_F), out_dtype),
        grid_spec=pltpu.PrefetchScalarGridSpec(
            num_scalar_prefetch=0,
            grid=(num_tiles,),
            in_specs=[
                pl.BlockSpec((tm, IN_F), lambda i: (i, 0)),      # x tile (streamed)
                pl.BlockSpec((IN_F, HID_F), lambda i: (0, 0)),   # w1 (resident)
                pl.BlockSpec((1, HID_F), lambda i: (0, 0)),      # b1 (resident)
                pl.BlockSpec((HID_F, OUT_F), lambda i: (0, 0)),  # w2 (resident)
                pl.BlockSpec((1, OUT_F), lambda i: (0, 0)),      # b2 (resident)
            ],
            out_specs=pl.BlockSpec((tm, OUT_F), lambda i: (i, 0)),
        ),
        compiler_params=pltpu.CompilerParams(
            dimension_semantics=("parallel",),
        ),
        cost_estimate=cost,
    )(xc, w1c, b1_2d, w2c, b2_2d)

    return out[:B] if b_pad != B else out


def _init_params(key):
    # Deterministic init mimicking nn.Linear default: U(-1/sqrt(fan_in), 1/sqrt(fan_in))
    k1, k2, k3, k4 = jax.random.split(key, 4)
    lim1 = 1.0 / jnp.sqrt(jnp.float32(IN_F))
    lim2 = 1.0 / jnp.sqrt(jnp.float32(HID_F))
    w1 = jax.random.uniform(k1, (IN_F, HID_F), jnp.float32, -lim1, lim1)
    b1 = jax.random.uniform(k2, (HID_F,), jnp.float32, -lim1, lim1)
    w2 = jax.random.uniform(k3, (HID_F, OUT_F), jnp.float32, -lim2, lim2)
    b2 = jax.random.uniform(k4, (OUT_F,), jnp.float32, -lim2, lim2)
    return w1, b1, w2, b2


def _reference_mixed(x, w1, b1, w2, b2, compute_dtype=jnp.bfloat16):
    # Same mixed-precision recipe as the kernel (bf16 MXU, f32 accumulation).
    h = jnp.dot(x.astype(compute_dtype), w1.astype(compute_dtype),
                preferred_element_type=jnp.float32) + b1
    h = jnp.maximum(h, 0.0)
    y = jnp.dot(h.astype(compute_dtype), w2.astype(compute_dtype),
                preferred_element_type=jnp.float32) + b2
    return jnp.maximum(y, 0.0)


if __name__ == "__main__":
    key = jax.random.PRNGKey(0)
    kx, kp = jax.random.split(key)

    # B=300 exercises both the multi-step grid (2 tiles of 256) and the
    # ragged-batch padding path.
    B = 300
    x = jax.random.normal(kx, (B, IN_F), jnp.float32)
    w1, b1, w2, b2 = _init_params(kp)

    out = fc_layer_forward(x, w1, b1, w2, b2)
    out = jax.block_until_ready(out)
    assert out.shape == (B, OUT_F)

    # Check against a mixed-precision JAX reference (same bf16/f32 recipe).
    ref_mixed = _reference_mixed(x, w1, b1, w2, b2)
    assert jnp.allclose(out, ref_mixed, atol=1e-2, rtol=1e-2), (
        float(jnp.max(jnp.abs(out - ref_mixed))))

    # Also sanity-check against the full-f32 PyTorch-equivalent math with a
    # tolerance that accounts for the bf16 compute path.
    ref_f32 = jnp.maximum(jnp.maximum(x @ w1 + b1, 0.0) @ w2 + b2, 0.0)
    assert jnp.allclose(out, ref_f32, atol=5e-2, rtol=5e-2), (
        float(jnp.max(jnp.abs(out - ref_f32))))

    print("KERNEL_OK")
</pallas_src>

<mosaic_0001>
module attributes {stable_mosaic.version = 11 : i64} {
  func.func @_mlp_kernel(%arg0: i32, %arg1: memref<256x512xbf16, #tpu.memory_space<vmem>>, %arg2: memref<512x256xbf16, #tpu.memory_space<vmem>>, %arg3: memref<1x256xf32, #tpu.memory_space<vmem>>, %arg4: memref<256x128xbf16, #tpu.memory_space<vmem>>, %arg5: memref<1x128xf32, #tpu.memory_space<vmem>>, %arg6: memref<256x128xf32, #tpu.memory_space<vmem>>) attributes {dimension_semantics = [#tpu.dimension_semantics<parallel>], iteration_bounds = array<i64: 2>, scalar_prefetch = 0 : i64, scratch_operands = 0 : i64, tpu.core_type = #tpu.core_type<tc>, window_params = [{transform_indices = @transform_0, window_bounds = array<i64: 256, 512>}, {pipeline_mode = #tpu.pipeline_mode<synchronous>, transform_indices = @transform_1, window_bounds = array<i64: 512, 256>}, {pipeline_mode = #tpu.pipeline_mode<synchronous>, transform_indices = @transform_2, window_bounds = array<i64: 1, 256>}, {pipeline_mode = #tpu.pipeline_mode<synchronous>, transform_indices = @transform_3, window_bounds = array<i64: 256, 128>}, {pipeline_mode = #tpu.pipeline_mode<synchronous>, transform_indices = @transform_4, window_bounds = array<i64: 1, 128>}, {transform_indices = @transform_5, window_bounds = array<i64: 256, 128>}]} {
    %c0 = arith.constant 0 : index
    %c0_0 = arith.constant 0 : index
    %0 = vector.load %arg1[%c0, %c0_0] : memref<256x512xbf16, #tpu.memory_space<vmem>>, vector<256x512xbf16>
    %c0_1 = arith.constant 0 : index
    %c0_2 = arith.constant 0 : index
    %1 = vector.load %arg2[%c0_1, %c0_2] : memref<512x256xbf16, #tpu.memory_space<vmem>>, vector<512x256xbf16>
    %cst = arith.constant dense<0.000000e+00> : vector<256x256xf32>
    %2 = tpu.matmul %0, %1, %cst {dimension_numbers = #tpu.dot_dimension_numbers<[1], [0], [0], [1], [0, 0, 1, 1], [], []>} : vector<256x512xbf16>, vector<512x256xbf16>, vector<256x256xf32> -> vector<256x256xf32>
    %c0_3 = arith.constant 0 : index
    %c0_4 = arith.constant 0 : index
    %3 = vector.load %arg3[%c0_3, %c0_4] : memref<1x256xf32, #tpu.memory_space<vmem>>, vector<1x256xf32>
    %4 = vector.broadcast %3 : vector<1x256xf32> to vector<256x256xf32>
    %5 = arith.addf %2, %4 : vector<256x256xf32>
    %cst_5 = arith.constant 0.000000e+00 : f32
    %6 = vector.broadcast %cst_5 : f32 to vector<256x256xf32>
    %7 = arith.maximumf %5, %6 : vector<256x256xf32>
    %8 = arith.truncf %7 : vector<256x256xf32> to vector<256x256xbf16>
    %c0_6 = arith.constant 0 : index
    %c0_7 = arith.constant 0 : index
    %9 = vector.load %arg4[%c0_6, %c0_7] : memref<256x128xbf16, #tpu.memory_space<vmem>>, vector<256x128xbf16>
    %cst_8 = arith.constant dense<0.000000e+00> : vector<256x128xf32>
    %10 = tpu.matmul %8, %9, %cst_8 {dimension_numbers = #tpu.dot_dimension_numbers<[1], [0], [0], [1], [0, 0, 1, 1], [], []>} : vector<256x256xbf16>, vector<256x128xbf16>, vector<256x128xf32> -> vector<256x128xf32>
    %c0_9 = arith.constant 0 : index
    %c0_10 = arith.constant 0 : index
    %11 = vector.load %arg5[%c0_9, %c0_10] : memref<1x128xf32, #tpu.memory_space<vmem>>, vector<1x128xf32>
    %12 = vector.broadcast %11 : vector<1x128xf32> to vector<256x128xf32>
    %13 = arith.addf %10, %12 : vector<256x128xf32>
    %cst_11 = arith.constant 0.000000e+00 : f32
    %14 = vector.broadcast %cst_11 : f32 to vector<256x128xf32>
    %15 = arith.maximumf %13, %14 : vector<256x128xf32>
    %c0_12 = arith.constant 0 : index
    %c0_13 = arith.constant 0 : index
    %16 = vector.load %arg6[%c0_12, %c0_13] : memref<256x128xf32, #tpu.memory_space<vmem>>, vector<256x128xf32>
    tpu.vector_store %arg6[%c0_12, %c0_13], %15 {strides = array<i32>} : memref<256x128xf32, #tpu.memory_space<vmem>>, vector<256x128xf32>,
    return
  }
  func.func @transform_0(%arg0: i32) -> (i32, i32) {
    %c0_i32 = arith.constant 0 : i32
    %c0_i32_0 = arith.constant 0 : i32
    return %arg0, %c0_i32 : i32, i32
  }
  func.func @transform_1(%arg0: i32) -> (i32, i32) {
    %c0_i32 = arith.constant 0 : i32
    %c0_i32_0 = arith.constant 0 : i32
    %c0_i32_1 = arith.constant 0 : i32
    return %c0_i32, %c0_i32_0 : i32, i32
  }
  func.func @transform_2(%arg0: i32) -> (i32, i32) {
    %c0_i32 = arith.constant 0 : i32
    %c0_i32_0 = arith.constant 0 : i32
    %c0_i32_1 = arith.constant 0 : i32
    return %c0_i32, %c0_i32_0 : i32, i32
  }
  func.func @transform_3(%arg0: i32) -> (i32, i32) {
    %c0_i32 = arith.constant 0 : i32
    %c0_i32_0 = arith.constant 0 : i32
    %c0_i32_1 = arith.constant 0 : i32
    return %c0_i32, %c0_i32_0 : i32, i32
  }
  func.func @transform_4(%arg0: i32) -> (i32, i32) {
    %c0_i32 = arith.constant 0 : i32
    %c0_i32_0 = arith.constant 0 : i32
    %c0_i32_1 = arith.constant 0 : i32
    return %c0_i32, %c0_i32_0 : i32, i32
  }
  func.func @transform_5(%arg0: i32) -> (i32, i32) {
    %c0_i32 = arith.constant 0 : i32
    %c0_i32_0 = arith.constant 0 : i32
    return %arg0, %c0_i32 : i32, i32
  }
}

</mosaic_0001>

<bundles_post_ra>
// kernel: tpu_custom_call.1
= control target key start
LH: loop header
LB: loop body
LE: loop exit
PB: predicated region body
PF: predicated region fallthrough
CT: control target
= control target key end

     0   :  { %10 = vsyncpa [#allocation3], 0  ;;  %s4558_s0 = inlined_call_operand.hbm [shape: bf16[512,512], index: 0, kind: input, shape index: {}]   ;;  %s4559_s1 = inlined_call_operand.hbm [shape: bf16[512,256], index: 1, kind: input, shape index: {}]   ;;  %s4560_s2 = inlined_call_operand.hbm [shape: f32[1,256], index: 2, kind: input, shape index: {}]   ;;  %s4561_s3 = inlined_call_operand.hbm [shape: bf16[256,128], index: 3, kind: input, shape index: {}]   ;;  %s4562_s4 = inlined_call_operand.vmem [shape: f32[1,128], index: 4, kind: input, shape index: {}]   ;;  %s4563_s5 = inlined_call_operand.hbm [shape: f32[512,128], index: 5, kind: output, shape index: {}]  }
   0x1   :  { %12 = vsyncpa [#allocation3 + $0x1], 0 }
   0x2   :  { %13 = vsyncpa [#allocation6], 0 }
   0x3   :  { %14 = vsyncpa [#allocation9], 0 }
   0x4   :  { %15 = vsyncpa [#allocation4], 0 }
   0x5   :  { %17 = vsyncpa [#allocation4 + $0x1], 0  ;;  %s3453_s18 = smov 0   ;;  %s3455_s19 = smov 0  }
   0x6   :  { %s3457_s20 = smov 0   ;;  %s3459_s21 = smov 0  }
   0x7 LB: > { %s3474_s22 = sadd.s32 4294967295, %s3410_s21   ;;  %s2370_s23 = sadd.s32 4294967294, %s3410_s21   ;;  %s3410_s21 = sphi %s3459_s21, %s4670_s21   ;;  %s3406_s20 = sphi %s3457_s20, %s4669_s20   ;;  %s3402_s19 = sphi %s3455_s19, %s4668_s19   ;;  %s3398_s18 = sphi %s3453_s18, %s4667_s18  }
   0x8   : > { %p43_p0 = scmp.ne.s32.totalorder %s3402_s19, %s3398_s18  ;;  %p44_p1 = scmp.eq.s32.totalorder %s3474_s22, 0 }
   0x9   : > { %p151_p2 = scmp.eq.s32.totalorder %s3474_s22, 1  ;;  %p157_p3 = scmp.eq.s32.totalorder %s2370_s23, 1 }
   0xa   : > { %p3483_p4 = por %p44_p1, %p43_p0  ;;  %p2371_p5 = scmp.ge.s32.totalorder %s3410_s21, 1 }
   0xb   : > { %p3488_p6 = por %p157_p3, %p43_p0  ;;  %p164_p7 = scmp.lt.s32.totalorder %s3410_s21, 3 }
   0xc   : > { %s175_s28 = sshll.u32 %s4559_s1, 4  ;;  %s3412_s30 = smov [#allocation5]   ;;  %s176_s28 = int_to_ptr.hbm [resolvable:$true] %s175_s28 }
   0xd   : > { %p3496_p8 = pnand %p2371_p5, %p164_p7  ;;  %s177_s6 = sshll.u32 %s3412_s30, 4  ;;  %s178_s6 = int_to_ptr.vmem [resolvable:$true] %s177_s6 }
   0xe   : > { %s190_s10 = sshll.u32 %s4560_s2, 4  ;;  %s3413_s11 = smov 128   ;;  %s191_s10 = int_to_ptr.hbm [resolvable:$true] %s190_s10 }
   0xf   : > { %p3146_p9 = pneg %p3496_p8  ;;  %s3414_s12 = smov 8  }
  0x10   : > { %s3415_s13 = smov [#allocation7]   ;;  %s201_s17 = sshll.u32 %s4561_s3, 4  ;;  %s202_s17 = int_to_ptr.hbm [resolvable:$true] %s201_s17 }
  0x11   : > { %p3504_p10 = pnand %p3146_p9, %p44_p1  ;;  %s192_s14 = sshll.u32 %s3415_s13, 4  ;;  %s193_s14 = int_to_ptr.vmem [resolvable:$true] %s192_s14 }
  0x12   : > { %s3416_s23 = smov [#allocation8]   ;;  %s3417_s27 = smov 64  }
  0x13   : > { %3149 = dma.hbm_to_vmem [thread:$0]  (!%p3504_p10), %s176_s28, 8192, %s178_s6, [#allocation6], %s3413_s11, %s3413_s11, %s3414_s12  }
  0x14   : > { %3152 = dma.hbm_to_vmem [thread:$0]  (!%p3504_p10), %s191_s10, 32, %s193_s14, [#allocation6]  }
  0x15   : > { %s203_s26 = sshll.u32 %s3416_s23, 4  ;;  %s3418_s28 = smov 4   ;;  %s204_s26 = int_to_ptr.vmem [resolvable:$true] %s203_s26 }
  0x16   : > { %3155 = dma.hbm_to_vmem [thread:$0]  (!%p3504_p10), %s202_s17, 2048, %s204_s26, [#allocation9], %s3417_s27, %s3417_s27, %s3418_s28  }
  0x17   : > { %s3522_s30 = sadd.s32 1, %s3410_s21   ;;  %s30_s8 = sadd.s32 1, %s3406_s20 }
  0x18   : > { %s27_s6 = ssub.s32 %s3410_s21, %s3522_s30  ;;  %p37_p13 = scmp.ne.s32.totalorder %s3406_s20, %s3402_s19 }
  0x19   : > { %p28_p12 = scmp.eq.s32.totalorder %s27_s6, 0  ;;  %p38_p0 = scmp.eq.s32.totalorder %s3410_s21, 0 }
  0x1a   : > { %p3167_p3 = scmp.lt.s32.totalorder %s3410_s21, 2  ;;  %p3536_p7 = por %p151_p2, %p37_p13 }
  0x1b   : > { %s3532_s9 = scalar_select %p28_p12, %s3406_s20, %s30_s8  }
  0x1c   : > { %p39_p5 = por %p38_p0, %p37_p13  ;;  %s220_s7 = sand.u32 1, %s3406_s20  }
  0x1d   : > { %s2968_s11 = sshll.u32 %s3410_s21, 9  ;;  %s2376_s12 = sshll.u32 %s220_s7, 9 }
  0x1e   : > { %s230_s15 = scalar_lea.hbm %s4558_s0, %s2968_s11  ;;  %s224_s17 = scalar_lea.vmem [#allocation2], %s2376_s12 }
  0x1f   : > { %s231_s16 = sshll.u32 %s230_s15, 4  ;;  %s233_s23 = sshll.u32 %s224_s17, 4  ;;  %s232_s16 = int_to_ptr.hbm [resolvable:$true] %s231_s16  ;;  %s234_s23 = int_to_ptr.vmem [resolvable:$true] %s233_s23 }
  0x20   : > { %p3547_p9 = pnand %p3167_p3, %p39_p5  ;;  %s221_s27 = scalar_lea.sflag [#allocation3], %s220_s7 }
  0x21   : > { %s3306_s28 = sshra.s32 %s232_s16, 4  ;;  %s3313_s12 = scalar_lea.hbm %s4558_s0, 1024  ;;  %s3307_s28 = int_to_ptr.hbm [resolvable:$true] %s3306_s28 }
  0x22   : > { %s3308_s6 = scalar_lea.hbm %s3307_s28, 512  ;;  %p3310_p10 = pneg %p3547_p9 }
  0x23   : > { %p3309_p2 = scmp.ne.s32.totalorder %s3307_s28, %s3308_s6  ;;  %p3314_p0 = scmp.lt.s32.totalorder %s3307_s28, %s4558_s0 }
  0x24   : > { %p3315_p3 = scmp.lt.s32.totalorder %s3313_s12, %s3308_s6 }
  0x25   : > { %p3311_p12 = pnand %p3310_p10, %p3309_p2 }
  0x26   : > { %p3316_p5 = por %p3315_p3, %p3314_p0 }
  0x27   : > { %p3312_p13 = pneg %p3311_p12 }
  0x29   : > { %p3317_p11 = pnand %p3316_p5, %p3312_p13 }
  0x2b   : > { %3320 = shalt.err (!%p3317_p11)
}
  0x2c   : > { %s3419_s7 = smov 256   ;;  %s3420_s15 = smov 16  }
  0x2d   : > { %3159 = dma.hbm_to_vmem [thread:$0]  (!%p3547_p9), %s232_s16, 8192, %s234_s23, %s221_s27, %s3419_s7, %s3419_s7, %s3420_s15  }
  0x2e   : > { %245 = sbr.rel (%p3496_p8) target bundleno = 1007 (0x3ef), region = 40 }
  0x33   : > { %s3564_s17 = sand.u32 1, %s3402_s19  }
  0x34   : > { %s2381_s8 = sshll.u32 %s3564_s17, 9  ;;  %s248_s28 = scalar_lea.sflag [#allocation3], %s3564_s17 }
  0x35   : > { %s3568_s6 = scalar_lea.vmem [#allocation2], %s2381_s8 }
  0x36   : > { %3381 = dma.done.wait (%p3483_p4), %s248_s28, 8192  }
  0x37   : > { %3383 = vsyncadd (%p3483_p4), %s248_s28, 4294959104 }
  0x38   : > { %3385 = dma.done.wait (%p44_p1), [#allocation6], 8224  }
  0x39   : > { %3387 = vsyncadd (%p44_p1), [#allocation6], 4294959072 }
  0x3a   : > { %3389 = dma.done.wait (%p44_p1), [#allocation9], 2048  }
  0x3b   : > { %3391 = vsyncadd (%p44_p1), [#allocation9], 4294965248  ;;  %v2700_v0 = vld [vmem:[#allocation5 + $0x70] sm:$0xf]  ;;  %v3048_v1 = vld [vmem:[#allocation5 + $0x74] sm:$0xf0] }
  0x3c   : > { %v2764_v2 = vld [vmem:[#allocation5 + $0xf0] sm:$0xf]  ;;  %v2701_v3 = vor.u32 %v3048_v1, %v2700_v0  ;;  %v3064_v4 = vld [vmem:[#allocation5 + $0xf4] sm:$0xf0]  ;;  %v2692_v5 = vld [vmem:[#allocation5 + $0x60] sm:$0xf] }
  0x3d   : > { %v3046_v6 = vld [vmem:[#allocation5 + $0x64] sm:$0xf0]  ;;  %v2765_v7 = vor.u32 %v3064_v4, %v2764_v2  ;;  %v2756_v8 = vld [vmem:[#allocation5 + $0xe0] sm:$0xf]  ;;  %v2684_v12 = vld [vmem:[#allocation5 + $0x50] sm:$0xf] }
  0x3e   : > { %v3062_v9 = vld [vmem:[#allocation5 + $0xe4] sm:$0xf0]  ;;  %1070 = vmatpush.bf16.msra.mxu0 %v2701_v3  ;;  %3114 = vmatpush.bf16.msra.mxu2 %v2701_v3  ;;  %v2693_v10 = vor.u32 %v3046_v6, %v2692_v5  ;;  %v3044_v13 = vld [vmem:[#allocation5 + $0x54] sm:$0xf0]  ;;  %v2748_v14 = vld [vmem:[#allocation5 + $0xd0] sm:$0xf] }
  0x3f   : > { %3122 = vmatpush.bf16.msra.mxu3 %v2765_v7  ;;  %v2757_v11 = vor.u32 %v3062_v9, %v2756_v8  ;;  %1159 = vmatpush.bf16.msra.mxu1 %v2765_v7  ;;  %v3060_v15 = vld [vmem:[#allocation5 + $0xd4] sm:$0xf0]  ;;  %v2685_v16 = vor.u32 %v3044_v13, %v2684_v12  ;;  %v2676_v18 = vld [vmem:[#allocation5 + $0x40] sm:$0xf]  ;;  %v3042_v19 = vld [vmem:[#allocation5 + $0x44] sm:$0xf0] }
  0x40   : > { %v2749_v17 = vor.u32 %v3060_v15, %v2748_v14  ;;  %v2740_v20 = vld [vmem:[#allocation5 + $0xc0] sm:$0xf]  ;;  %v3058_v21 = vld [vmem:[#allocation5 + $0xc4] sm:$0xf0]  ;;  %v2677_v22 = vor.u32 %v3042_v19, %v2676_v18  ;;  %v2668_v24 = vld [vmem:[#allocation5 + $0x30] sm:$0xf] }
  0x41   : > { %v2741_v23 = vor.u32 %v3058_v21, %v2740_v20  ;;  %v3040_v25 = vld [vmem:[#allocation5 + $0x34] sm:$0xf0]  ;;  %v2732_v26 = vld [vmem:[#allocation5 + $0xb0] sm:$0xf]  ;;  %v2660_v30 = vld [vmem:[#allocation5 + $0x20] sm:$0xf] }
  0x42   : > { %1071 = vmatpush.bf16.msra.mxu0 %v2693_v10  ;;  %3115 = vmatpush.bf16.msra.mxu2 %v2693_v10  ;;  %v3056_v27 = vld [vmem:[#allocation5 + $0xb4] sm:$0xf0]  ;;  %v2669_v28 = vor.u32 %v3040_v25, %v2668_v24  ;;  %v3038_v31 = vld [vmem:[#allocation5 + $0x24] sm:$0xf0]  ;;  %v2724_v32 = vld [vmem:[#allocation5 + $0xa0] sm:$0xf] }
  0x43   : > { %3123 = vmatpush.bf16.msra.mxu3 %v2757_v11  ;;  %1160 = vmatpush.bf16.msra.mxu1 %v2757_v11  ;;  %v2733_v29 = vor.u32 %v3056_v27, %v2732_v26  ;;  %v3054_v33 = vld [vmem:[#allocation5 + $0xa4] sm:$0xf0]  ;;  %v2661_v34 = vor.u32 %v3038_v31, %v2660_v30  ;;  %v2652_v36 = vld [vmem:[#allocation5 + $0x10] sm:$0xf]  ;;  %v3036_v37 = vld [vmem:[#allocation5 + $0x14] sm:$0xf0] }
  0x44   : > { %v2725_v35 = vor.u32 %v3054_v33, %v2724_v32  ;;  %v2716_v38 = vld [vmem:[#allocation5 + $0x90] sm:$0xf]  ;;  %v3052_v39 = vld [vmem:[#allocation5 + $0x94] sm:$0xf0]  ;;  %v2653_v40 = vor.u32 %v3036_v37, %v2652_v36  ;;  %v2644_v42 = vld [vmem:[#allocation5] sm:$0xf] }
  0x45   : > { %v2717_v41 = vor.u32 %v3052_v39, %v2716_v38  ;;  %v3034_v43 = vld [vmem:[#allocation5 + $0x4] sm:$0xf0]  ;;  %v2708_v44 = vld [vmem:[#allocation5 + $0x80] sm:$0xf]  ;;  %v2828_v46 = vld [vmem:[#allocation5 + $0x170] sm:$0xf] }
  0x46   : > { %1072 = vmatpush.bf16.msra.mxu0 %v2685_v16  ;;  %3116 = vmatpush.bf16.msra.mxu2 %v2685_v16  ;;  %v3050_v45 = vld [vmem:[#allocation5 + $0x84] sm:$0xf0]  ;;  %v3080_v47 = vld [vmem:[#allocation5 + $0x174] sm:$0xf0]  ;;  %v2388_v48 = vld [vmem:[%s3568_s6] sm:$0xf]  ;;  %v2645_v51 = vor.u32 %v3034_v43, %v2644_v42 }
  0x47   : > { %3124 = vmatpush.bf16.msra.mxu3 %v2749_v17  ;;  %1161 = vmatpush.bf16.msra.mxu1 %v2749_v17  ;;  %v2892_v49 = vld [vmem:[#allocation5 + $0x1f0] sm:$0xf]  ;;  %v3096_v50 = vld [vmem:[#allocation5 + $0x1f4] sm:$0xf0]  ;;  %v2516_v53 = vld [vmem:[%s3568_s6 + $0x100] sm:$0xf]  ;;  %v2709_v55 = vor.u32 %v3050_v45, %v2708_v44  ;;  %v2829_v58 = vor.u32 %v3080_v47, %v2828_v46 }
  0x48   : > { %v2971_v52 = vld [vmem:[%s3568_s6 + $0xc] sm:$0xf0]  ;;  %v3001_v56 = vld [vmem:[%s3568_s6 + $0x104] sm:$0xf]  ;;  %v2518_v57 = vld [vmem:[%s3568_s6 + $0x110] sm:$0xf0]  ;;  %v2893_v59 = vor.u32 %v3096_v50, %v2892_v49 }
  0x49   : > { %v3003_v54 = vld [vmem:[%s3568_s6 + $0x10c] sm:$0xf0]  ;;  %v2820_v60 = vld [vmem:[#allocation5 + $0x160] sm:$0xf]  ;;  %v3078_v61 = vld [vmem:[#allocation5 + $0x164] sm:$0xf0]  ;;  %v3588_v62 = vor.u32 %v2971_v52, %v2388_v48  ;;  %v3592_v2 = vor.u32 %v3001_v56, %v2518_v57 }
  0x4a   : > { %1073 = vmatpush.bf16.msra.mxu0 %v2677_v22  ;;  %3117 = vmatpush.bf16.msra.mxu2 %v2677_v22  ;;  %v3590_v63 = vor.u32 %v3003_v54, %v2516_v53  ;;  %v2884_v0 = vld [vmem:[#allocation5 + $0x1e0] sm:$0xf]  ;;  %v3094_v1 = vld [vmem:[#allocation5 + $0x1e4] sm:$0xf0]  ;;  %v2821_v3 = vor.u32 %v3078_v61, %v2820_v60  ;;  %v2812_v5 = vld [vmem:[#allocation5 + $0x150] sm:$0xf] }
  0x4b   : > { %3125 = vmatpush.bf16.msra.mxu3 %v2741_v23  ;;  %1162 = vmatpush.bf16.msra.mxu1 %v2741_v23  ;;  %v2885_v4 = vor.u32 %v3094_v1, %v2884_v0  ;;  %v3076_v6 = vld [vmem:[#allocation5 + $0x154] sm:$0xf0]  ;;  %v2876_v7 = vld [vmem:[#allocation5 + $0x1d0] sm:$0xf]  ;;  %v2404_v11 = vld [vmem:[%s3568_s6 + $0x20] sm:$0xf] }
  0x4c   : > { %v2813_v8 = vor.u32 %v3076_v6, %v2812_v5  ;;  %v3092_v9 = vld [vmem:[#allocation5 + $0x1d4] sm:$0xf0]  ;;  %v2975_v12 = vld [vmem:[%s3568_s6 + $0x2c] sm:$0xf0]  ;;  %v2532_v13 = vld [vmem:[%s3568_s6 + $0x120] sm:$0xf] }
  0x4d   : > { %v2877_v10 = vor.u32 %v3092_v9, %v2876_v7  ;;  %v3007_v14 = vld [vmem:[%s3568_s6 + $0x12c] sm:$0xf0]  ;;  %v3005_v15 = vld [vmem:[%s3568_s6 + $0x124] sm:$0xf]  ;;  %v2534_v16 = vld [vmem:[%s3568_s6 + $0x130] sm:$0xf0]  ;;  %v3603_v17 = vor.u32 %v2975_v12, %v2404_v11 }
  0x4e   : > { %1074 = vmatpush.bf16.msra.mxu0 %v2669_v28  ;;  %3118 = vmatpush.bf16.msra.mxu2 %v2669_v28  ;;  %v3605_v18 = vor.u32 %v3007_v14, %v2532_v13  ;;  %v3607_v19 = vor.u32 %v3005_v15, %v2534_v16  ;;  %v2804_v20 = vld [vmem:[#allocation5 + $0x140] sm:$0xf]  ;;  %v3074_v21 = vld [vmem:[#allocation5 + $0x144] sm:$0xf0]  ;;  %v2979_v27 = vld [vmem:[%s3568_s6 + $0x4c] sm:$0xf0] }
  0x4f   : > { %3126 = vmatpush.bf16.msra.mxu3 %v2733_v29  ;;  %1163 = vmatpush.bf16.msra.mxu1 %v2733_v29  ;;  %v2868_v22 = vld [vmem:[#allocation5 + $0x1c0] sm:$0xf]  ;;  %v2805_v23 = vor.u32 %v3074_v21, %v2804_v20  ;;  %v3090_v24 = vld [vmem:[#allocation5 + $0x1c4] sm:$0xf0]  ;;  %v3011_v29 = vld [vmem:[%s3568_s6 + $0x14c] sm:$0xf0] }
  0x50   : > { %v2869_v25 = vor.u32 %v3090_v24, %v2868_v22  ;;  %v2420_v26 = vld [vmem:[%s3568_s6 + $0x40] sm:$0xf]  ;;  %v3009_v30 = vld [vmem:[%s3568_s6 + $0x144] sm:$0xf]  ;;  %v2550_v31 = vld [vmem:[%s3568_s6 + $0x150] sm:$0xf0] }
  0x51   : > { %v2548_v28 = vld [vmem:[%s3568_s6 + $0x140] sm:$0xf]  ;;  %v3618_v32 = vor.u32 %v2979_v27, %v2420_v26  ;;  %v3072_v36 = vld [vmem:[#allocation5 + $0x134] sm:$0xf0]  ;;  %v2860_v37 = vld [vmem:[#allocation5 + $0x1b0] sm:$0xf] }
  0x52   : > { %1075 = vmatpush.bf16.msra.mxu0 %v2661_v34  ;;  %3119 = vmatpush.bf16.msra.mxu2 %v2661_v34  ;;  %v3620_v33 = vor.u32 %v3011_v29, %v2548_v28  ;;  %v3622_v34 = vor.u32 %v3009_v30, %v2550_v31  ;;  %v3088_v39 = vld [vmem:[#allocation5 + $0x1b4] sm:$0xf0]  ;;  %v2983_v42 = vld [vmem:[%s3568_s6 + $0x6c] sm:$0xf0]  ;;  %v2564_v43 = vld [vmem:[%s3568_s6 + $0x160] sm:$0xf] }
  0x53   : > { %3127 = vmatpush.bf16.msra.mxu3 %v2725_v35  ;;  %1164 = vmatpush.bf16.msra.mxu1 %v2725_v35  ;;  %v2796_v35 = vld [vmem:[#allocation5 + $0x130] sm:$0xf]  ;;  %v3013_v45 = vld [vmem:[%s3568_s6 + $0x164] sm:$0xf]  ;;  %v2566_v46 = vld [vmem:[%s3568_s6 + $0x170] sm:$0xf0] }
  0x54   : > { %v2797_v38 = vor.u32 %v3072_v36, %v2796_v35  ;;  %v3015_v44 = vld [vmem:[%s3568_s6 + $0x16c] sm:$0xf0]  ;;  %v3637_v49 = vor.u32 %v3013_v45, %v2566_v46  ;;  %v2788_v50 = vld [vmem:[#allocation5 + $0x120] sm:$0xf]  ;;  %v3086_v54 = vld [vmem:[#allocation5 + $0x1a4] sm:$0xf0] }
  0x55   : > { %v3635_v48 = vor.u32 %v3015_v44, %v2564_v43  ;;  %v2852_v52 = vld [vmem:[#allocation5 + $0x1a0] sm:$0xf]  ;;  %v2987_v57 = vld [vmem:[%s3568_s6 + $0x8c] sm:$0xf0]  ;;  %v3017_v60 = vld [vmem:[%s3568_s6 + $0x184] sm:$0xf] }
  0x56   : > { %1076 = vmatpush.bf16.msra.mxu0 %v2653_v40  ;;  %3120 = vmatpush.bf16.msra.mxu2 %v2653_v40  ;;  %v2861_v40 = vor.u32 %v3088_v39, %v2860_v37  ;;  %v2452_v56 = vld [vmem:[%s3568_s6 + $0x80] sm:$0xf]  ;;  %v2582_v61 = vld [vmem:[%s3568_s6 + $0x190] sm:$0xf0]  ;;  %v2702_v5 = vld [vmem:[#allocation5 + $0x78] sm:$0xf0] }
  0x57   : > { %3128 = vmatpush.bf16.msra.mxu3 %v2717_v41  ;;  %1165 = vmatpush.bf16.msra.mxu1 %v2717_v41  ;;  %v2436_v41 = vld [vmem:[%s3568_s6 + $0x60] sm:$0xf]  ;;  %v3648_v0 = vor.u32 %v2987_v57, %v2452_v56  ;;  %v2780_v7 = vld [vmem:[#allocation5 + $0x110] sm:$0xf]  ;;  %v3084_v11 = vld [vmem:[#allocation5 + $0x194] sm:$0xf0] }
  0x58   : > { %v3633_v47 = vor.u32 %v2983_v42, %v2436_v41  ;;  %v2844_v9 = vld [vmem:[#allocation5 + $0x190] sm:$0xf]  ;;  %v3045_v12 = vld [vmem:[#allocation5 + $0x64] sm:$0xf]  ;;  %v2694_v13 = vld [vmem:[#allocation5 + $0x68] sm:$0xf0] }
  0x59   : > { %v2845_v14 = vor.u32 %v3084_v11, %v2844_v9  ;;  %v2697_v15 = vor.u32 %v3045_v12, %v2694_v13  ;;  %v3043_v16 = vld [vmem:[#allocation5 + $0x54] sm:$0xf]  ;;  %v2686_v20 = vld [vmem:[#allocation5 + $0x58] sm:$0xf0]  ;;  %v3041_v22 = vld [vmem:[#allocation5 + $0x44] sm:$0xf] }
  0x5a   : > { %1077 = vmatpush.bf16.msra.mxu0 %v2645_v51  ;;  %3121 = vmatpush.bf16.msra.mxu2 %v2645_v51  ;;  %v3070_v51 = vld [vmem:[#allocation5 + $0x124] sm:$0xf0]  ;;  %v2689_v21 = vor.u32 %v3043_v16, %v2686_v20  ;;  %v2468_v24 = vld [vmem:[%s3568_s6 + $0xa0] sm:$0xf]  ;;  %v3023_v27 = vld [vmem:[%s3568_s6 + $0x1ac] sm:$0xf0] }
  0x5b   : > { %3129 = vmatpush.bf16.msra.mxu3 %v2709_v55  ;;  %1166 = vmatpush.bf16.msra.mxu1 %v2709_v55  ;;  %v2789_v53 = vor.u32 %v3070_v51, %v2788_v50  ;;  %v2853_v55 = vor.u32 %v3086_v54, %v2852_v52  ;;  %v2596_v26 = vld [vmem:[%s3568_s6 + $0x1a0] sm:$0xf]  ;;  %v3021_v28 = vld [vmem:[%s3568_s6 + $0x1a4] sm:$0xf]  ;;  %v2598_v29 = vld [vmem:[%s3568_s6 + $0x1b0] sm:$0xf0] }
  0x5c   : > { %v3665_v35 = vor.u32 %v3023_v27, %v2596_v26  ;;  %v3667_v36 = vor.u32 %v3021_v28, %v2598_v29  ;;  %v3039_v37 = vld [vmem:[#allocation5 + $0x34] sm:$0xf]  ;;  %v3066_v41 = vld [vmem:[#allocation5 + $0x104] sm:$0xf0]  ;;  %v2836_v42 = vld [vmem:[#allocation5 + $0x180] sm:$0xf] }
  0x5d   : > { %1078 = vmatmul.bf16.vlgmr.msra.gmra.mxu0 %v3588_v62  ;;  %1118 = vmatmul.bf16.vlgmr.msra.gmra.mxu2 %v3590_v63  ;;  %v3082_v44 = vld [vmem:[#allocation5 + $0x184] sm:$0xf0]  ;;  %v3037_v45 = vld [vmem:[#allocation5 + $0x24] sm:$0xf]  ;;  %v2662_v46 = vld [vmem:[#allocation5 + $0x28] sm:$0xf0] }
  0x5e   : > { %1248 = vmatpush.bf16.msrb.mxu2 %v2829_v58  ;;  %1207 = vmatmul.bf16.vlgmr.msra.gmra.mxu3 %v3592_v2  ;;  %v2580_v58 = vld [vmem:[%s3568_s6 + $0x180] sm:$0xf]  ;;  %4593 = vst [vmem:[#allocation16_spill] sm:$0xff] %v3667_v36  ;;  %v2837_v50 = vor.u32 %v3082_v44, %v2836_v42  ;;  %v2665_v51 = vor.u32 %v3037_v45, %v2662_v46  ;;  %v3035_v52 = vld [vmem:[#allocation5 + $0x14] sm:$0xf]  ;;  %s2385_s16 = sshll.u32 %s3564_s17, 8 }
  0x5f   : > { %1337 = vmatpush.bf16.msrb.mxu3 %v2893_v59  ;;  %v3019_v59 = vld [vmem:[%s3568_s6 + $0x18c] sm:$0xf0]  ;;  %v2612_v57 = vld [vmem:[%s3568_s6 + $0x1c0] sm:$0xf]  ;;  %v3079_v9 = vld [vmem:[#allocation5 + $0x174] sm:$0xf] }
  0x60   : > { %v3650_v1 = vor.u32 %v3019_v59, %v2580_v58  ;;  %v2995_v56 = vld [vmem:[%s3568_s6 + $0xcc] sm:$0xf0]  ;;  %v3025_v59 = vld [vmem:[%s3568_s6 + $0x1c4] sm:$0xf]  ;;  %v3095_v11 = vld [vmem:[#allocation5 + $0x1f4] sm:$0xf] }
  0x61   : > { %v3027_v58 = vld [vmem:[%s3568_s6 + $0x1cc] sm:$0xf0]  ;;  %v2894_v13 = vld [vmem:[#allocation5 + $0x1f8] sm:$0xf0]  ;;  %v2630_v26 = vld [vmem:[%s3568_s6 + $0x1f0] sm:$0xf0] }
  0x62   : > { %1249 = vmatpush.bf16.msrb.mxu2 %v2821_v3  ;;  %v3652_v3 = vor.u32 %v3017_v60, %v2582_v61  ;;  %v2614_v60 = vld [vmem:[%s3568_s6 + $0x1d0] sm:$0xf0]  ;;  %v3033_v61 = vld [vmem:[#allocation5 + $0x4] sm:$0xf]  ;;  %v2897_v16 = vor.u32 %v3095_v11, %v2894_v13  ;;  %v2396_v42 = vld [vmem:[%s3568_s6 + $0x8] sm:$0xf] }
  0x63   : > { %1338 = vmatpush.bf16.msrb.mxu3 %v2885_v4  ;;  %v3047_v4 = vld [vmem:[#allocation5 + $0x74] sm:$0xf]  ;;  %v2970_v44 = vld [vmem:[%s3568_s6 + $0xc] sm:$0xf]  ;;  %v2398_v45 = vld [vmem:[%s3568_s6 + $0x18] sm:$0xf0] }
  0x64   : > { %4592 = vst [vmem:[#allocation15_spill] sm:$0xff] %v3652_v3  ;;  %v2705_v6 = vor.u32 %v3047_v4, %v2702_v5  ;;  %v2646_v4 = vld [vmem:[#allocation5 + $0x8] sm:$0xf0]  ;;  %s4411_s23 = scalar_lea.vmem [#allocation10], %s2385_s16  ;;  %s3113_s26 = sshll.u32 %s3474_s22, 8 }
  0x65   : > { %v2758_v13 = vld [vmem:[#allocation5 + $0xe8] sm:$0xf0]  ;;  %s2264_s12 = scalar_lea.hbm %s4563_s5, %s3113_s26  ;;  %s2265_s13 = sshll.u32 %s4411_s23, 4  ;;  %s2266_s13 = int_to_ptr.vmem [resolvable:$true] %s2265_s13 }
  0x66   : > { %1250 = vmatpush.bf16.msrb.mxu2 %v2813_v8  ;;  %v3068_v8 = vld [vmem:[#allocation5 + $0x114] sm:$0xf0]  ;;  %1426 = vmatpush.bf16.msrb.mxu0 %v2705_v6  ;;  %v3680_v6 = vor.u32 %v3027_v58, %v2612_v57  ;;  %v2886_v58 = vld [vmem:[#allocation5 + $0x1e8] sm:$0xf0]  ;;  %s2267_s14 = sshll.u32 %s2264_s12, 4  ;;  %s2253_s7 = scalar_lea.sflag [#allocation4], %s3564_s17  ;;  %s2268_s14 = int_to_ptr.hbm [resolvable:$true] %s2267_s14 }
  0x67   : > { %1339 = vmatpush.bf16.msrb.mxu3 %v2877_v10  ;;  %v2781_v10 = vor.u32 %v3068_v8, %v2780_v7  ;;  %v2649_v7 = vor.u32 %v3033_v61, %v2646_v4  ;;  %v3682_v8 = vor.u32 %v3025_v59, %v2614_v60  ;;  %v2977_v59 = vld [vmem:[%s3568_s6 + $0x44] sm:$0xf]  ;;  %v2422_v60 = vld [vmem:[%s3568_s6 + $0x50] sm:$0xf0]  ;;  %s3350_s22 = sshra.s32 %s2268_s14, 4  ;;  %s3351_s22 = int_to_ptr.hbm [resolvable:$true] %s3350_s22 }
  0x68   : > { %s3352_s15 = scalar_lea.hbm %s3351_s22, 256  ;;  %p3357_p11 = scmp.lt.s32.totalorder %s3351_s22, %s4563_s5 }
  0x69   : > { %4594 = vst [vmem:[#allocation17_spill] sm:$0xff] %v3682_v8  ;;  %p3353_p1 = scmp.ne.s32.totalorder %s3351_s22, %s3352_s15 }
  0x6a   : > { %1251 = vmatpush.bf16.msrb.mxu2 %v2805_v23  ;;  %1427 = vmatpush.bf16.msrb.mxu0 %v2697_v15  ;;  %v2678_v23 = vld [vmem:[#allocation5 + $0x48] sm:$0xf0]  ;;  %v2390_v15 = vld [vmem:[%s3568_s6 + $0x10] sm:$0xf0] }
  0x6b   : > { %1340 = vmatpush.bf16.msrb.mxu3 %v2869_v25  ;;  %v2991_v25 = vld [vmem:[%s3568_s6 + $0xac] sm:$0xf0]  ;;  %v2681_v30 = vor.u32 %v3041_v22, %v2678_v23  ;;  %v2628_v23 = vld [vmem:[%s3568_s6 + $0x1e0] sm:$0xf]  ;;  %p3354_p4 = pnand %p3353_p1, %p3536_p7 }
  0x6c   : > { %v3663_v31 = vor.u32 %v2991_v25, %v2468_v24  ;;  %v2999_v22 = vld [vmem:[%s3568_s6 + $0xec] sm:$0xf0]  ;;  %v3029_v25 = vld [vmem:[%s3568_s6 + $0x1e4] sm:$0xf] }
  0x6d   : > { %1083 = vmatmul.bf16.gmra.mxu0 %v3603_v17  ;;  %1123 = vmatmul.bf16.gmra.mxu2 %v3605_v18  ;;  %v3031_v24 = vld [vmem:[%s3568_s6 + $0x1ec] sm:$0xf0]  ;;  %v3702_v29 = vor.u32 %v3029_v25, %v2630_v26  ;;  %p3355_p8 = pneg %p3354_p4 }
  0x6e   : > { %1212 = vmatmul.bf16.gmra.mxu3 %v3607_v19  ;;  %1252 = vmatpush.bf16.msrb.mxu2 %v2797_v38  ;;  %v2670_v38 = vld [vmem:[#allocation5 + $0x38] sm:$0xf0]  ;;  %v3700_v28 = vor.u32 %v3031_v24, %v2628_v23 }
  0x6f   : > { %1341 = vmatpush.bf16.msrb.mxu3 %v2861_v40  ;;  %1428 = vmatpush.bf16.msrb.mxu0 %v2689_v21  ;;  %v2673_v39 = vor.u32 %v3039_v37, %v2670_v38  ;;  %v2772_v40 = vld [vmem:[#allocation5 + $0x100] sm:$0xf]  ;;  %4595 = vst [vmem:[#allocation18_spill] sm:$0xff] %v3702_v29  ;;  %v2406_v37 = vld [vmem:[%s3568_s6 + $0x30] sm:$0xf0] }
  0x70   : > { %v2773_v43 = vor.u32 %v3066_v41, %v2772_v40  ;;  %v2500_v21 = vld [vmem:[%s3568_s6 + $0xe0] sm:$0xf]  ;;  %v2766_v40 = vld [vmem:[#allocation5 + $0xf8] sm:$0xf0] }
  0x71   : > { %v3698_v27 = vor.u32 %v2999_v22, %v2500_v21  ;;  %v2974_v21 = vld [vmem:[%s3568_s6 + $0x2c] sm:$0xf]  ;;  %v2414_v22 = vld [vmem:[%s3568_s6 + $0x38] sm:$0xf0] }
  0x72   : > { %1253 = vmatpush.bf16.msrb.mxu2 %v2789_v53  ;;  %v2654_v53 = vld [vmem:[#allocation5 + $0x18] sm:$0xf0] }
  0x73   : > { %1342 = vmatpush.bf16.msrb.mxu3 %v2853_v55  ;;  %1429 = vmatpush.bf16.msrb.mxu0 %v2681_v30  ;;  %v2657_v54 = vor.u32 %v3035_v52, %v2654_v53  ;;  %v2484_v55 = vld [vmem:[%s3568_s6 + $0xc0] sm:$0xf]  ;;  %v2973_v30 = vld [vmem:[%s3568_s6 + $0x24] sm:$0xf]  ;;  %v3722_v52 = vor.u32 %v2970_v44, %v2398_v45 }
  0x74   : > { %v3678_v5 = vor.u32 %v2995_v56, %v2484_v55  ;;  %v3709_v38 = vor.u32 %v2973_v30, %v2406_v37  ;;  %v2822_v55 = vld [vmem:[#allocation5 + $0x168] sm:$0xf0]  ;;  %v3093_v56 = vld [vmem:[#allocation5 + $0x1e4] sm:$0xf]  ;;  %v3749_v37 = vor.u32 %v2974_v21, %v2414_v22  ;;  %v2814_v21 = vld [vmem:[#allocation5 + $0x158] sm:$0xf0] }
  0x75   : > { %v2889_v4 = vor.u32 %v3093_v56, %v2886_v58  ;;  %v3059_v56 = vld [vmem:[#allocation5 + $0xd4] sm:$0xf]  ;;  %v2428_v58 = vld [vmem:[%s3568_s6 + $0x48] sm:$0xf] }
  0x76   : > { %1254 = vmatpush.bf16.msrb.mxu2 %v2781_v10  ;;  %v2830_v10 = vld [vmem:[#allocation5 + $0x178] sm:$0xf0]  ;;  %v3091_v22 = vld [vmem:[#allocation5 + $0x1d4] sm:$0xf] }
  0x77   : > { %1343 = vmatpush.bf16.msrb.mxu3 %v2845_v14  ;;  %1430 = vmatpush.bf16.msrb.mxu0 %v2673_v39  ;;  %v2833_v12 = vor.u32 %v3079_v9, %v2830_v10  ;;  %v2969_v14 = vld [vmem:[%s3568_s6 + $0x4] sm:$0xf]  ;;  %v3063_v39 = vld [vmem:[#allocation5 + $0xf4] sm:$0xf] }
  0x78   : > { %v3689_v20 = vor.u32 %v2969_v14, %v2390_v15  ;;  %v2769_v41 = vor.u32 %v3063_v39, %v2766_v40  ;;  %v2412_v15 = vld [vmem:[%s3568_s6 + $0x28] sm:$0xf]  ;;  %v2981_v40 = vld [vmem:[%s3568_s6 + $0x64] sm:$0xf] }
  0x7a   : > { %1255 = vmatpush.bf16.msrb.mxu2 %v2773_v43  ;;  %1167 = vmatmul.bf16.vlgmr.msra.gmra.mxu1 %v3689_v20  ;;  %v2972_v43 = vld [vmem:[%s3568_s6 + $0x14] sm:$0xf0] }
  0x7b   : > { %1344 = vmatpush.bf16.msrb.mxu3 %v2837_v50  ;;  %1431 = vmatpush.bf16.msrb.mxu0 %v2665_v51  ;;  %v3716_v46 = vor.u32 %v2972_v43, %v2396_v42  ;;  %v3718_v50 = vld [vmem:[#allocation7] sm:$0x3] }
  0x7c   : > { %1515 = vmatpush.bf16.msrb.mxu1 %v2769_v41  ;;  %v3725_v53 = vperm.slane %v3718_v50, 0  ;;  %v2438_v41 = vld [vmem:[%s3568_s6 + $0x70] sm:$0xf0] }
  0x7d   : > { %1088 = vmatmul.bf16.gmra.mxu0 %v3618_v32  ;;  %1128 = vmatmul.bf16.gmra.mxu2 %v3620_v33  ;;  %v3758_v43 = vor.u32 %v2981_v40, %v2438_v41  ;;  %v2454_v40 = vld [vmem:[%s3568_s6 + $0x90] sm:$0xf0] }
  0x7e   : > { %1217 = vmatmul.bf16.gmra.mxu3 %v3622_v34  ;;  %1604 = vmatpush.bf16.msra.mxu2 %v2833_v12  ;;  %v3061_v12 = vld [vmem:[#allocation5 + $0xe4] sm:$0xf] }
  0x7f   : > { %1432 = vmatpush.bf16.msrb.mxu0 %v2657_v54  ;;  %1693 = vmatpush.bf16.msra.mxu3 %v2897_v16  ;;  %v3077_v54 = vld [vmem:[#allocation5 + $0x164] sm:$0xf]  ;;  %v2761_v14 = vor.u32 %v3061_v12, %v2758_v13  ;;  %v2976_v16 = vld [vmem:[%s3568_s6 + $0x34] sm:$0xf0] }
  0x80   : > { %v2825_v57 = vor.u32 %v3077_v54, %v2822_v55  ;;  %v3745_v26 = vor.u32 %v2976_v16, %v2412_v15  ;;  %v3075_v16 = vld [vmem:[#allocation5 + $0x154] sm:$0xf] }
  0x81   : > { %1516 = vmatpush.bf16.msrb.mxu1 %v2761_v14 }
  0x82   : > { %1605 = vmatpush.bf16.msra.mxu2 %v2825_v57 }
  0x83   : > { %1433 = vmatpush.bf16.msrb.mxu0 %v2649_v7  ;;  %v3732_v7 = vor.u32 %v2977_v59, %v2422_v60  ;;  %1694 = vmatpush.bf16.msra.mxu3 %v2889_v4  ;;  %v2980_v59 = vld [vmem:[%s3568_s6 + $0x54] sm:$0xf0]  ;;  %v2978_v60 = vld [vmem:[%s3568_s6 + $0x4c] sm:$0xf] }
  0x84   : > { %v3771_v12 = vor.u32 %v2980_v59, %v2428_v58  ;;  %v2742_v58 = vld [vmem:[#allocation5 + $0xc8] sm:$0xf0] }
  0x86   : > { %4596 = vst [vmem:[#allocation19_spill] sm:$0xff] %v3771_v12 }
  0x8a   : > { %1172 = vmatmul.bf16.gmra.mxu1 %v3709_v38 }
  0x8d   : > { %1093 = vmatmul.bf16.gmra.mxu0 %v3633_v47  ;;  %1133 = vmatmul.bf16.gmra.mxu2 %v3635_v48 }
  0x8e   : > { %1222 = vmatmul.bf16.gmra.mxu3 %v3637_v49 }
  0x9a   : > { %1177 = vmatmul.bf16.gmra.mxu1 %v3732_v7 }
  0x9d   : > { %1098 = vmatmul.bf16.gmra.mxu0 %v3648_v0  ;;  %1138 = vmatmul.bf16.gmra.mxu2 %v3650_v1 }
  0x9e   : > { %1227 = vmatmul.bf16.gmra.mxu3 %v3652_v3 }
  0xaa   : > { %1182 = vmatmul.bf16.gmra.mxu1 %v3758_v43 }
  0xad   : > { %1103 = vmatmul.bf16.gmra.mxu0 %v3663_v31  ;;  %1143 = vmatmul.bf16.gmra.mxu2 %v3665_v35 }
  0xae   : > { %1232 = vmatmul.bf16.gmra.mxu3 %v3667_v36 }
  0xbd   : > { %1108 = vmatmul.bf16.gmra.mxu0 %v3678_v5  ;;  %1148 = vmatmul.bf16.gmra.mxu2 %v3680_v6 }
  0xbe   : > { %1237 = vmatmul.bf16.gmra.mxu3 %v3682_v8 }
  0xcd   : > { %1113 = vmatmul.bf16.gmra.mxu0 %v3698_v27  ;;  %1153 = vmatmul.bf16.gmra.mxu2 %v3700_v28 }
  0xce   : > { %1242 = vmatmul.bf16.gmra.mxu3 %v3702_v29 }
  0xda   : > { %v3720_v51 = vpop.f32.mrf.mxu0 }
  0xdd   : > { %1256 = vmatmul.bf16.vlgmr.msrb.gmra.mxu2 %v3716_v46  ;;  %1434 = vmatmul.bf16.vlgmr.msrb.gmra.mxu0 %v3588_v62 }
  0xde   : > { %1345 = vmatmul.bf16.vlgmr.msrb.gmra.mxu3 %v3722_v52 }
  0xe0   : > { %v1119_v61 = vpop.f32.mrf.mxu2 }
  0xe1   : > { %v1120_v9 = vadd.f32 %v1119_v61, %v3725_v53  ;;  %v1208_v62 = vpop.f32.mrf.mxu3  ;;  %v2430_v61 = vld [vmem:[%s3568_s6 + $0x58] sm:$0xf0] }
  0xe2   : > { %v3735_v10 = vpop.f32.mrf.mxu0  ;;  %v3775_v14 = vor.u32 %v2978_v60, %v2430_v61  ;;  %v2444_v60 = vld [vmem:[%s3568_s6 + $0x68] sm:$0xf]  ;;  %v2984_v61 = vld [vmem:[%s3568_s6 + $0x74] sm:$0xf0] }
  0xe3   : > { %v3738_v11 = vadd.f32 %v1208_v62, %v1120_v9 }
  0xe4   : > { %4597 = vst [vmem:[#allocation20_spill] sm:$0xff] %v3775_v14 }
  0xe8   : > { %v1121_v23 = vpop.f32.mrf.mxu2 }
  0xe9   : > { %v1122_v24 = vadd.f32 %v1121_v23, %v3725_v53  ;;  %v1210_v25 = vpop.f32.mrf.mxu3  ;;  %v2817_v23 = vor.u32 %v3075_v16, %v2814_v21 }
  0xea   : > { %v3747_v30 = vpop.f32.mrf.mxu0 }
  0xeb   : > { %v3751_v39 = vadd.f32 %v1210_v25, %v1122_v24  ;;  %v2878_v24 = vld [vmem:[#allocation5 + $0x1d8] sm:$0xf0]  ;;  %v2985_v25 = vld [vmem:[%s3568_s6 + $0x84] sm:$0xf]  ;;  %1606 = vmatpush.bf16.msra.mxu2 %v2817_v23 }
  0xed   : > { %1261 = vmatmul.bf16.gmra.mxu2 %v3745_v26  ;;  %1439 = vmatmul.bf16.gmra.mxu0 %v3603_v17  ;;  %v2750_v17 = vld [vmem:[#allocation5 + $0xd8] sm:$0xf0] }
  0xee   : > { %1350 = vmatmul.bf16.gmra.mxu3 %v3749_v37  ;;  %v2753_v57 = vor.u32 %v3059_v56, %v2750_v17 }
  0xf0   : > { %v1124_v42 = vpop.f32.mrf.mxu2  ;;  %1517 = vmatpush.bf16.msrb.mxu1 %v2753_v57  ;;  %v3057_v57 = vld [vmem:[#allocation5 + $0xc4] sm:$0xf] }
  0xf1   : > { %v1125_v44 = vadd.f32 %v1124_v42, %v3725_v53  ;;  %v1213_v45 = vpop.f32.mrf.mxu3  ;;  %v2881_v42 = vor.u32 %v3091_v22, %v2878_v24  ;;  %v2745_v59 = vor.u32 %v3057_v57, %v2742_v58  ;;  %v3797_v22 = vor.u32 %v2984_v61, %v2444_v60  ;;  %v3055_v60 = vld [vmem:[#allocation5 + $0xb4] sm:$0xf] }
  0xf2   : > { %v3761_v54 = vpop.f32.mrf.mxu0 }
  0xf3   : > { %v3764_v55 = vadd.f32 %v1213_v45, %v1125_v44  ;;  %v3784_v44 = vor.u32 %v2985_v25, %v2454_v40  ;;  %1695 = vmatpush.bf16.msra.mxu3 %v2881_v42  ;;  %4599 = vst [vmem:[#allocation22_spill] sm:$0xff] %v3797_v22  ;;  %v2989_v40 = vld [vmem:[%s3568_s6 + $0xa4] sm:$0xf] }
  0xf4   : > { %1518 = vmatpush.bf16.msrb.mxu1 %v2745_v59 }
  0xf5   : > { %1187 = vmatmul.bf16.gmra.mxu1 %v3784_v44 }
  0xf8   : > { %v1126_v4 = vpop.f32.mrf.mxu2 }
  0xf9   : > { %v1127_v9 = vadd.f32 %v1126_v4, %v3725_v53  ;;  %v1215_v62 = vpop.f32.mrf.mxu3  ;;  %v2982_v4 = vld [vmem:[%s3568_s6 + $0x6c] sm:$0xf] }
  0xfa   : > { %v3773_v13 = vpop.f32.mrf.mxu0 }
  0xfb   : > { %v3777_v15 = vadd.f32 %v1215_v62, %v1127_v9  ;;  %v2446_v9 = vld [vmem:[%s3568_s6 + $0x78] sm:$0xf0] }
  0xfc   : > { %v3801_v24 = vor.u32 %v2982_v4, %v2446_v9  ;;  %v2460_v4 = vld [vmem:[%s3568_s6 + $0x88] sm:$0xf]  ;;  %v2988_v9 = vld [vmem:[%s3568_s6 + $0x94] sm:$0xf0] }
  0xfd   : > { %1266 = vmatmul.bf16.gmra.mxu2 %v3771_v12  ;;  %1444 = vmatmul.bf16.gmra.mxu0 %v3618_v32 }
  0xfe   : > { %1355 = vmatmul.bf16.gmra.mxu3 %v3775_v14  ;;  %4600 = vst [vmem:[#allocation23_spill] sm:$0xff] %v3801_v24  ;;  %v2542_v14 = vld [vmem:[%s3568_s6 + $0x138] sm:$0xf0] }
 0x100   : > { %v1129_v41 = vpop.f32.mrf.mxu2 }
 0x101   : > { %v1130_v45 = vadd.f32 %v1129_v41, %v3725_v53  ;;  %v1218_v32 = vpop.f32.mrf.mxu3  ;;  %v2470_v41 = vld [vmem:[%s3568_s6 + $0xb0] sm:$0xf0] }
 0x102   : > { %v3787_v56 = vpop.f32.mrf.mxu0 }
 0x103   : > { %v3790_v17 = vadd.f32 %v1218_v32, %v1130_v45  ;;  %v3810_v45 = vor.u32 %v2989_v40, %v2470_v41 }
 0x105   : > { %4598 = vst [vmem:[#allocation21_spill] sm:$0xff] %v3790_v17  ;;  %1192 = vmatmul.bf16.gmra.mxu1 %v3810_v45  ;;  %v2510_v17 = vld [vmem:[%s3568_s6 + $0xf8] sm:$0xf0] }
 0x108   : > { %v1131_v62 = vpop.f32.mrf.mxu2 }
 0x109   : > { %v1132_v16 = vadd.f32 %v1131_v62, %v3725_v53  ;;  %v1220_v21 = vpop.f32.mrf.mxu3  ;;  %v2986_v62 = vld [vmem:[%s3568_s6 + $0x8c] sm:$0xf] }
 0x10a   : > { %v3799_v23 = vpop.f32.mrf.mxu0 }
 0x10b   : > { %v3803_v25 = vadd.f32 %v1220_v21, %v1132_v16  ;;  %v2462_v16 = vld [vmem:[%s3568_s6 + $0x98] sm:$0xf0] }
 0x10d   : > { %4601 = vst [vmem:[#allocation24_spill] sm:$0xff] %v3803_v25  ;;  %1271 = vmatmul.bf16.gmra.mxu2 %v3797_v22  ;;  %1449 = vmatmul.bf16.gmra.mxu0 %v3633_v47  ;;  %v2734_v47 = vld [vmem:[#allocation5 + $0xb8] sm:$0xf0]  ;;  %v2998_v25 = vld [vmem:[%s3568_s6 + $0xec] sm:$0xf] }
 0x10e   : > { %1360 = vmatmul.bf16.gmra.mxu3 %v3801_v24  ;;  %v2737_v61 = vor.u32 %v3055_v60, %v2734_v47  ;;  %v3073_v60 = vld [vmem:[#allocation5 + $0x144] sm:$0xf]  ;;  %v2806_v47 = vld [vmem:[#allocation5 + $0x148] sm:$0xf0] }
 0x10f   : > { %v2809_v8 = vor.u32 %v3073_v60, %v2806_v47  ;;  %v3053_v47 = vld [vmem:[#allocation5 + $0xa4] sm:$0xf] }
 0x110   : > { %v1134_v42 = vpop.f32.mrf.mxu2  ;;  %1519 = vmatpush.bf16.msrb.mxu1 %v2737_v61  ;;  %v3089_v61 = vld [vmem:[#allocation5 + $0x1c4] sm:$0xf] }
 0x111   : > { %v1135_v32 = vadd.f32 %v1134_v42, %v3725_v53  ;;  %v1223_v57 = vpop.f32.mrf.mxu3  ;;  %v3823_v42 = vor.u32 %v2988_v9, %v2460_v4  ;;  %v2993_v4 = vld [vmem:[%s3568_s6 + $0xc4] sm:$0xf]  ;;  %v2486_v9 = vld [vmem:[%s3568_s6 + $0xd0] sm:$0xf0]  ;;  %1607 = vmatpush.bf16.msra.mxu2 %v2809_v8 }
 0x112   : > { %v3813_v58 = vpop.f32.mrf.mxu0 }
 0x113   : > { %v3816_v59 = vadd.f32 %v1223_v57, %v1135_v32  ;;  %4603 = vst [vmem:[#allocation26_spill] sm:$0xff] %v3823_v42  ;;  %v3827_v32 = vor.u32 %v2986_v62, %v2462_v16  ;;  %v3836_v16 = vor.u32 %v2993_v4, %v2486_v9  ;;  %v2478_v4 = vld [vmem:[%s3568_s6 + $0xb8] sm:$0xf0] }
 0x115   : > { %4602 = vst [vmem:[#allocation25_spill] sm:$0xff] %v3816_v59  ;;  %1197 = vmatmul.bf16.gmra.mxu1 %v3836_v16 }
 0x116   : > { %4604 = vst [vmem:[#allocation27_spill] sm:$0xff] %v3827_v32 }
 0x118   : > { %v1136_v21 = vpop.f32.mrf.mxu2 }
 0x119   : > { %v1137_v40 = vadd.f32 %v1136_v21, %v3725_v53  ;;  %v1225_v41 = vpop.f32.mrf.mxu3  ;;  %v2870_v21 = vld [vmem:[#allocation5 + $0x1c8] sm:$0xf0] }
 0x11a   : > { %v3825_v29 = vpop.f32.mrf.mxu0  ;;  %v2873_v62 = vor.u32 %v3089_v61, %v2870_v21  ;;  %v2992_v61 = vld [vmem:[%s3568_s6 + $0xb4] sm:$0xf0]  ;;  %v2990_v21 = vld [vmem:[%s3568_s6 + $0xac] sm:$0xf] }
 0x11b   : > { %v3829_v57 = vadd.f32 %v1225_v41, %v1137_v40 }
 0x11c   : > { %1696 = vmatpush.bf16.msra.mxu3 %v2873_v62 }
 0x11d   : > { %4605 = vst [vmem:[#allocation28_spill] sm:$0xff] %v3829_v57  ;;  %1276 = vmatmul.bf16.gmra.mxu2 %v3823_v42  ;;  %1454 = vmatmul.bf16.gmra.mxu0 %v3648_v0  ;;  %v2476_v57 = vld [vmem:[%s3568_s6 + $0xa8] sm:$0xf] }
 0x11e   : > { %1365 = vmatmul.bf16.gmra.mxu3 %v3827_v32  ;;  %v2726_v32 = vld [vmem:[#allocation5 + $0xa8] sm:$0xf0]  ;;  %v3849_v59 = vor.u32 %v2992_v61, %v2476_v57 }
 0x11f   : > { %v2729_v42 = vor.u32 %v3053_v47, %v2726_v32  ;;  %v2502_v32 = vld [vmem:[%s3568_s6 + $0xf0] sm:$0xf0] }
 0x120   : > { %v1139_v36 = vpop.f32.mrf.mxu2  ;;  %4607 = vst [vmem:[#allocation30_spill] sm:$0xff] %v3849_v59 }
 0x121   : > { %v1140_v40 = vadd.f32 %v1139_v36, %v3725_v53  ;;  %v1228_v0 = vpop.f32.mrf.mxu3  ;;  %1520 = vmatpush.bf16.msrb.mxu1 %v2729_v42  ;;  %v2997_v42 = vld [vmem:[%s3568_s6 + $0xe4] sm:$0xf] }
 0x122   : > { %v3839_v41 = vpop.f32.mrf.mxu0  ;;  %v3862_v47 = vor.u32 %v2997_v42, %v2502_v32 }
 0x123   : > { %v3842_v60 = vadd.f32 %v1228_v0, %v1140_v40  ;;  %v3853_v40 = vor.u32 %v2990_v21, %v2478_v4 }
 0x125   : > { %4606 = vst [vmem:[#allocation29_spill] sm:$0xff] %v3842_v60  ;;  %1202 = vmatmul.bf16.gmra.mxu1 %v3862_v47  ;;  %v2494_v60 = vld [vmem:[%s3568_s6 + $0xd8] sm:$0xf0] }
 0x126   : > { %4608 = vst [vmem:[#allocation31_spill] sm:$0xff] %v3853_v40 }
 0x128   : > { %v1141_v36 = vpop.f32.mrf.mxu2 }
 0x129   : > { %v1142_v8 = vadd.f32 %v1141_v36, %v3725_v53  ;;  %v1230_v9 = vpop.f32.mrf.mxu3 }
 0x12a   : > { %v3851_v62 = vpop.f32.mrf.mxu0 }
 0x12b   : > { %v3855_v0 = vadd.f32 %v1230_v9, %v1142_v8  ;;  %v3051_v8 = vld [vmem:[#allocation5 + $0x94] sm:$0xf] }
 0x12d   : > { %4609 = vst [vmem:[#allocation32_spill] sm:$0xff] %v3855_v0  ;;  %1281 = vmatmul.bf16.gmra.mxu2 %v3849_v59  ;;  %1459 = vmatmul.bf16.gmra.mxu0 %v3663_v31  ;;  %v2718_v31 = vld [vmem:[#allocation5 + $0x98] sm:$0xf0]  ;;  %v2996_v59 = vld [vmem:[%s3568_s6 + $0xd4] sm:$0xf0] }
 0x12e   : > { %1370 = vmatmul.bf16.gmra.mxu3 %v3853_v40  ;;  %v2721_v9 = vor.u32 %v3051_v8, %v2718_v31  ;;  %v2492_v40 = vld [vmem:[%s3568_s6 + $0xc8] sm:$0xf]  ;;  %v2994_v0 = vld [vmem:[%s3568_s6 + $0xcc] sm:$0xf]  ;;  %v3071_v8 = vld [vmem:[#allocation5 + $0x134] sm:$0xf] }
 0x12f   : > { %v3879_v3 = vor.u32 %v2994_v0, %v2494_v60  ;;  %v3087_v31 = vld [vmem:[#allocation5 + $0x1b4] sm:$0xf]  ;;  %v2862_v60 = vld [vmem:[#allocation5 + $0x1b8] sm:$0xf0] }
 0x130   : > { %v1144_v57 = vpop.f32.mrf.mxu2  ;;  %1521 = vmatpush.bf16.msrb.mxu1 %v2721_v9 }
 0x131   : > { %v1145_v61 = vadd.f32 %v1144_v57, %v3725_v53  ;;  %v1233_v21 = vpop.f32.mrf.mxu3  ;;  %v3875_v57 = vor.u32 %v2996_v59, %v2492_v40  ;;  %4612 = vst [vmem:[#allocation35_spill] sm:$0xff] %v3879_v3  ;;  %v1168_v40 = vpop.f32.mrf.mxu1 }
 0x132   : > { %v3865_v4 = vpop.f32.mrf.mxu0 }
 0x133   : > { %v3868_v36 = vadd.f32 %v1233_v21, %v1145_v61  ;;  %4611 = vst [vmem:[#allocation34_spill] sm:$0xff] %v3875_v57  ;;  %v1080_v21 = vadd.f32 %v3720_v51, %v3725_v53  ;;  %v2865_v51 = vor.u32 %v3087_v31, %v2862_v60 }
 0x135   : > { %4610 = vst [vmem:[#allocation33_spill] sm:$0xff] %v3868_v36  ;;  %v3888_v9 = vadd.f32 %v1168_v40, %v1080_v21  ;;  %1697 = vmatpush.bf16.msra.mxu3 %v2865_v51  ;;  %v3000_v36 = vld [vmem:[%s3568_s6 + $0xf4] sm:$0xf0]  ;;  %v3904_v51 = vor.u32 %v2998_v25, %v2510_v17 }
 0x136   : > { %v3104_v17 = vld [vmem:[#allocation8 + $0x38] sm:$0xff] }
 0x137   : > { %4616 = vst [vmem:[#allocation39_spill] sm:$0xff] %v3904_v51  ;;  %2010 = vmatpush.bf16.msra.mxu0 %v3104_v17 }
 0x138   : > { %v1146_v24 = vpop.f32.mrf.mxu2 }
 0x139   : > { %v1147_v42 = vadd.f32 %v1146_v24, %v3725_v53  ;;  %v1235_v32 = vpop.f32.mrf.mxu3  ;;  %v2798_v24 = vld [vmem:[#allocation5 + $0x138] sm:$0xf0]  ;;  %v1170_v21 = vpop.f32.mrf.mxu1 }
 0x13a   : > { %v3877_v22 = vpop.f32.mrf.mxu0  ;;  %v2801_v59 = vor.u32 %v3071_v8, %v2798_v24  ;;  %v2710_v8 = vld [vmem:[#allocation5 + $0x88] sm:$0xf0] }
 0x13b   : > { %v3881_v61 = vadd.f32 %v1235_v32, %v1147_v42 }
 0x13c   : > { %1608 = vmatpush.bf16.msra.mxu2 %v2801_v59 }
 0x13d   : > { %4613 = vst [vmem:[#allocation36_spill] sm:$0xff] %v3881_v61  ;;  %1286 = vmatmul.bf16.gmra.mxu2 %v3875_v57  ;;  %1464 = vmatmul.bf16.gmra.mxu0 %v3678_v5  ;;  %v3049_v57 = vld [vmem:[#allocation5 + $0x84] sm:$0xf]  ;;  %v2508_v61 = vld [vmem:[%s3568_s6 + $0xe8] sm:$0xf] }
 0x13e   : > { %1375 = vmatmul.bf16.gmra.mxu3 %v3879_v3  ;;  %v2713_v24 = vor.u32 %v3049_v57, %v2710_v8 }
 0x140   : > { %v1149_v0 = vpop.f32.mrf.mxu2  ;;  %1522 = vmatpush.bf16.msrb.mxu1 %v2713_v24  ;;  %v3112_v24 = vld [vmem:[#allocation8 + $0x78] sm:$0xff] }
 0x141   : > { %v1150_v42 = vadd.f32 %v1149_v0, %v3725_v53  ;;  %v1238_v32 = vpop.f32.mrf.mxu3  ;;  %v3900_v0 = vor.u32 %v3000_v36, %v2508_v61  ;;  %v1173_v36 = vpop.f32.mrf.mxu1 }
 0x142   : > { %v3891_v5 = vpop.f32.mrf.mxu0 }
 0x143   : > { %v3893_v3 = vadd.f32 %v1238_v32, %v1150_v42  ;;  %4615 = vst [vmem:[#allocation38_spill] sm:$0xff] %v3900_v0  ;;  %1523 = vmatmul.bf16.vlgmr.msrb.gmra.mxu1 %v3689_v20  ;;  %v1085_v42 = vadd.f32 %v3747_v30, %v3725_v53 }
 0x144   : > { %2099 = vmatpush.bf16.msra.mxu1 %v3112_v24  ;;  %v2790_v24 = vld [vmem:[#allocation5 + $0x128] sm:$0xf0] }
 0x145   : > { %4614 = vst [vmem:[#allocation37_spill] sm:$0xff] %v3893_v3  ;;  %v3914_v61 = vadd.f32 %v1173_v36, %v1085_v42  ;;  %v3006_v3 = vld [vmem:[%s3568_s6 + $0x12c] sm:$0xf] }
 0x148   : > { %v1151_v40 = vpop.f32.mrf.mxu2 }
 0x149   : > { %v1152_v31 = vadd.f32 %v1151_v40, %v3725_v53  ;;  %v1240_v60 = vpop.f32.mrf.mxu3  ;;  %v2524_v40 = vld [vmem:[%s3568_s6 + $0x108] sm:$0xf] }
 0x14a   : > { %v3902_v59 = vpop.f32.mrf.mxu0 }
 0x14b   : > { %v3907_v57 = vadd.f32 %v1240_v60, %v1152_v31  ;;  %v3004_v31 = vld [vmem:[%s3568_s6 + $0x114] sm:$0xf0]  ;;  %v3002_v60 = vld [vmem:[%s3568_s6 + $0x10c] sm:$0xf] }
 0x14c   : > { %v3926_v36 = vor.u32 %v3004_v31, %v2524_v40  ;;  %v3085_v40 = vld [vmem:[#allocation5 + $0x1a4] sm:$0xf] }
 0x14d   : > { %4617 = vst [vmem:[#allocation40_spill] sm:$0xff] %v3907_v57  ;;  %1291 = vmatmul.bf16.gmra.mxu2 %v3900_v0  ;;  %1469 = vmatmul.bf16.gmra.mxu0 %v3698_v27  ;;  %v2526_v27 = vld [vmem:[%s3568_s6 + $0x118] sm:$0xf0] }
 0x14e   : > { %1380 = vmatmul.bf16.gmra.mxu3 %v3904_v51  ;;  %v1175_v51 = vpop.f32.mrf.mxu1  ;;  %4619 = vst [vmem:[#allocation42_spill] sm:$0xff] %v3926_v36  ;;  %v3930_v17 = vor.u32 %v3002_v60, %v2526_v27 }
 0x150   : > { %v1154_v25 = vpop.f32.mrf.mxu2  ;;  %4620 = vst [vmem:[#allocation43_spill] sm:$0xff] %v3930_v17 }
 0x151   : > { %v1155_v20 = vadd.f32 %v1154_v25, %v3725_v53  ;;  %v1243_v32 = vpop.f32.mrf.mxu3 }
 0x152   : > { %v3917_v8 = vpop.f32.mrf.mxu0 }
 0x153   : > { %v3919_v30 = vadd.f32 %v1243_v32, %v1155_v20  ;;  %1528 = vmatmul.bf16.gmra.mxu1 %v3709_v38  ;;  %v1090_v32 = vadd.f32 %v3773_v13, %v3725_v53  ;;  %v2854_v38 = vld [vmem:[#allocation5 + $0x1a8] sm:$0xf0] }
 0x154   : > { %v2857_v13 = vor.u32 %v3085_v40, %v2854_v38 }
 0x155   : > { %4618 = vst [vmem:[#allocation41_spill] sm:$0xff] %v3919_v30  ;;  %v3008_v30 = vld [vmem:[%s3568_s6 + $0x134] sm:$0xf0] }
 0x156   : > { %v1178_v60 = vpop.f32.mrf.mxu1  ;;  %1698 = vmatpush.bf16.msra.mxu3 %v2857_v13 }
 0x157   : > { %v3940_v27 = vadd.f32 %v1178_v60, %v1090_v32 }
 0x158   : > { %v1156_v0 = vpop.f32.mrf.mxu2 }
 0x159   : > { %v1157_v57 = vadd.f32 %v1156_v0, %v3725_v53  ;;  %v1245_v42 = vpop.f32.mrf.mxu3  ;;  %v3069_v0 = vld [vmem:[#allocation5 + $0x124] sm:$0xf] }
 0x15a   : > { %v3928_v25 = vpop.f32.mrf.mxu0  ;;  %v2793_v31 = vor.u32 %v3069_v0, %v2790_v24  ;;  %v2540_v24 = vld [vmem:[%s3568_s6 + $0x128] sm:$0xf] }
 0x15b   : > { %v3933_v20 = vadd.f32 %v1245_v42, %v1157_v57  ;;  %v1082_v42 = vadd.f32 %v3735_v10, %v3725_v53  ;;  %v3953_v38 = vor.u32 %v3008_v30, %v2540_v24  ;;  %v3103_v30 = vld [vmem:[#allocation8 + $0x30] sm:$0xff] }
 0x15c   : > { %1609 = vmatpush.bf16.msra.mxu2 %v2793_v31  ;;  %2011 = vmatpush.bf16.msra.mxu0 %v3103_v30  ;;  %v3111_v24 = vld [vmem:[#allocation8 + $0x70] sm:$0xff] }
 0x15d   : > { %4621 = vst [vmem:[#allocation44_spill] sm:$0xff] %v3933_v20  ;;  %1296 = vmatmul.bf16.gmra.mxu2 %v3926_v36  ;;  %1474 = vmatmul.bf16.gmra.mxu0 %v3590_v63  ;;  %v1171_v0 = vadd.f32 %v1170_v21, %v1082_v42  ;;  %v1095_v21 = vadd.f32 %v3799_v23, %v3725_v53 }
 0x15e   : > { %1385 = vmatmul.bf16.gmra.mxu3 %v3930_v17  ;;  %v3951_v12 = vpop.f32.mrf.mxu1  ;;  %v1087_v23 = vadd.f32 %v3761_v54, %v3725_v53  ;;  %2100 = vmatpush.bf16.msra.mxu1 %v3111_v24  ;;  %v3083_v24 = vld [vmem:[#allocation5 + $0x194] sm:$0xf] }
 0x160   : > { %v1257_v57 = vpop.f32.mrf.mxu2 }
 0x161   : > { %v1258_v63 = vadd.f32 %v1257_v57, %v3888_v9  ;;  %v1346_v17 = vpop.f32.mrf.mxu3  ;;  %v3957_v9 = vor.u32 %v3006_v3, %v2542_v14 }
 0x162   : > { %v3945_v36 = vpop.f32.mrf.mxu0 }
 0x163   : > { %v1347_v20 = vadd.f32 %v1346_v17, %v1258_v63  ;;  %1533 = vmatmul.bf16.gmra.mxu1 %v3732_v7 }
 0x165   : > { %v1782_v17 = vmax.f32 %v1347_v20, 0.0 }
 0x166   : > { %v1183_v7 = vpop.f32.mrf.mxu1 }
 0x167   : > { %v3967_v13 = vadd.f32 %v1183_v7, %v1095_v21 }
 0x168   : > { %v1259_v32 = vpop.f32.mrf.mxu2 }
 0x169   : > { %v1260_v40 = vadd.f32 %v1259_v32, %v1171_v0  ;;  %v1348_v60 = vpop.f32.mrf.mxu3  ;;  %v1176_v0 = vadd.f32 %v1175_v51, %v1087_v23  ;;  %v2556_v32 = vld [vmem:[%s3568_s6 + $0x148] sm:$0xf] }
 0x16a   : > { %v3955_v10 = vpop.f32.mrf.mxu0 }
 0x16b   : > { %v1349_v31 = vadd.f32 %v1348_v60, %v1260_v40  ;;  %v3012_v40 = vld [vmem:[%s3568_s6 + $0x154] sm:$0xf0]  ;;  %v3010_v60 = vld [vmem:[%s3568_s6 + $0x14c] sm:$0xf] }
 0x16c   : > { %v3980_v7 = vor.u32 %v3012_v40, %v2556_v32 }
 0x16d   : > { %v1784_v57 = vmax.f32 %v1349_v31, 0.0  ;;  %1301 = vmatmul.bf16.gmra.mxu2 %v3953_v38  ;;  %1479 = vmatmul.bf16.gmra.mxu0 %v3605_v18  ;;  %v2558_v31 = vld [vmem:[%s3568_s6 + $0x158] sm:$0xf0] }
 0x16e   : > { %1390 = vmatmul.bf16.gmra.mxu3 %v3957_v9 }
 0x16f   : > { %v3965_v3 = vpack.c.bf16 %v1784_v57, %v1782_v17  ;;  %v3978_v17 = vpop.f32.mrf.mxu1 }
 0x170   : > { %v1262_v14 = vpop.f32.mrf.mxu2 }
 0x171   : > { %v1263_v20 = vadd.f32 %v1262_v14, %v3914_v61  ;;  %v1351_v42 = vpop.f32.mrf.mxu3  ;;  %v3984_v61 = vor.u32 %v3010_v60, %v2558_v31  ;;  %v1100_v14 = vadd.f32 %v3825_v29, %v3725_v53 }
 0x172   : > { %v3972_v18 = vpop.f32.mrf.mxu0 }
 0x173   : > { %v1352_v63 = vadd.f32 %v1351_v42, %v1263_v20  ;;  %4622 = vst [vmem:[#allocation45_spill] sm:$0xff] %v3984_v61  ;;  %1538 = vmatmul.bf16.gmra.mxu1 %v3758_v43  ;;  %v3067_v42 = vld [vmem:[#allocation5 + $0x114] sm:$0xf]  ;;  %v2846_v43 = vld [vmem:[#allocation5 + $0x198] sm:$0xf0] }
 0x174   : > { %v2849_v31 = vor.u32 %v3083_v24, %v2846_v43 }
 0x175   : > { %v1786_v23 = vmax.f32 %v1352_v63, 0.0 }
 0x176   : > { %1699 = vmatpush.bf16.msra.mxu3 %v2849_v31 }
 0x177   : > { %v1188_v40 = vpop.f32.mrf.mxu1 }
 0x178   : > { %v1264_v21 = vpop.f32.mrf.mxu2  ;;  %v3994_v63 = vadd.f32 %v1188_v40, %v1100_v14 }
 0x179   : > { %v1265_v57 = vadd.f32 %v1264_v21, %v1176_v0  ;;  %v1353_v30 = vpop.f32.mrf.mxu3  ;;  %v2782_v0 = vld [vmem:[#allocation5 + $0x118] sm:$0xf0] }
 0x17a   : > { %v3982_v54 = vpop.f32.mrf.mxu0  ;;  %v2785_v32 = vor.u32 %v3067_v42, %v2782_v0  ;;  %v2572_v0 = vld [vmem:[%s3568_s6 + $0x168] sm:$0xf] }
 0x17b   : > { %v1354_v51 = vadd.f32 %v1353_v30, %v1265_v57 }
 0x17c   : > { %1610 = vmatpush.bf16.msra.mxu2 %v2785_v32 }
 0x17d   : > { %v1788_v20 = vmax.f32 %v1354_v51, 0.0  ;;  %1306 = vmatmul.bf16.gmra.mxu2 %v3980_v7  ;;  %1484 = vmatmul.bf16.gmra.mxu0 %v3620_v33  ;;  %v1092_v33 = vadd.f32 %v3787_v56, %v3725_v53 }
 0x17e   : > { %1395 = vmatmul.bf16.gmra.mxu3 %v3984_v61  ;;  %v2574_v61 = vld [vmem:[%s3568_s6 + $0x178] sm:$0xf0] }
 0x17f   : > { %v3992_v60 = vpack.c.bf16 %v1788_v20, %v1786_v23  ;;  %v1181_v42 = vadd.f32 %v3951_v12, %v1092_v33  ;;  %v3016_v23 = vld [vmem:[%s3568_s6 + $0x174] sm:$0xf0]  ;;  %v3014_v20 = vld [vmem:[%s3568_s6 + $0x16c] sm:$0xf]  ;;  %v4006_v14 = vpop.f32.mrf.mxu1  ;;  %v1105_v12 = vadd.f32 %v3851_v62, %v3725_v53  ;;  %v1097_v62 = vadd.f32 %v3813_v58, %v3725_v53 }
 0x180   : > { %v1267_v29 = vpop.f32.mrf.mxu2  ;;  %v4008_v56 = vor.u32 %v3016_v23, %v2572_v0  ;;  %v4012_v32 = vor.u32 %v3014_v20, %v2574_v61 }
 0x181   : > { %v1268_v21 = vadd.f32 %v1267_v29, %v3940_v27  ;;  %v1356_v57 = vpop.f32.mrf.mxu3  ;;  %v1186_v20 = vadd.f32 %v3978_v17, %v1097_v62  ;;  %v1110_v62 = vadd.f32 %v3877_v22, %v3725_v53 }
 0x182   : > { %v3999_v30 = vpop.f32.mrf.mxu0 }
 0x183   : > { %v1357_v51 = vadd.f32 %v1356_v57, %v1268_v21  ;;  %1543 = vmatmul.bf16.gmra.mxu1 %v3784_v44  ;;  %v3102_v21 = vld [vmem:[#allocation8 + $0x28] sm:$0xff] }
 0x184   : > { %2012 = vmatpush.bf16.msra.mxu0 %v3102_v21 }
 0x185   : > { %v1790_v31 = vmax.f32 %v1357_v51, 0.0 }
 0x187   : > { %v1193_v61 = vpop.f32.mrf.mxu1 }
 0x188   : > { %v1269_v24 = vpop.f32.mrf.mxu2 }
 0x189   : > { %v1270_v40 = vadd.f32 %v1269_v24, %v1181_v42  ;;  %v1358_v43 = vpop.f32.mrf.mxu3  ;;  %v4022_v42 = vadd.f32 %v1193_v61, %v1105_v12  ;;  %v3110_v24 = vld [vmem:[#allocation8 + $0x68] sm:$0xff] }
 0x18a   : > { %v4010_v27 = vpop.f32.mrf.mxu0  ;;  %2101 = vmatpush.bf16.msra.mxu1 %v3110_v24  ;;  %v2774_v24 = vld [vmem:[#allocation5 + $0x108] sm:$0xf0] }
 0x18b   : > { %v1359_v29 = vadd.f32 %v1358_v43, %v1270_v40  ;;  %v2588_v40 = vld [vmem:[%s3568_s6 + $0x188] sm:$0xf]  ;;  %v3020_v43 = vld [vmem:[%s3568_s6 + $0x194] sm:$0xf0] }
 0x18c   : > { %v4036_v58 = vor.u32 %v3020_v43, %v2588_v40  ;;  %v3081_v40 = vld [vmem:[#allocation5 + $0x184] sm:$0xf] }
 0x18d   : > { %v1792_v33 = vmax.f32 %v1359_v29, 0.0  ;;  %1311 = vmatmul.bf16.gmra.mxu2 %v4008_v56  ;;  %1489 = vmatmul.bf16.gmra.mxu0 %v3635_v48  ;;  %v3018_v29 = vld [vmem:[%s3568_s6 + $0x18c] sm:$0xf] }
 0x18e   : > { %1400 = vmatmul.bf16.gmra.mxu3 %v4012_v32  ;;  %4623 = vst [vmem:[#allocation46_spill] sm:$0xff] %v4036_v58 }
 0x18f   : > { %v4020_v57 = vpack.c.bf16 %v1792_v33, %v1790_v31  ;;  %v2590_v31 = vld [vmem:[%s3568_s6 + $0x198] sm:$0xf0]  ;;  %v4034_v12 = vpop.f32.mrf.mxu1 }
 0x190   : > { %v1272_v44 = vpop.f32.mrf.mxu2 }
 0x191   : > { %v1273_v51 = vadd.f32 %v1272_v44, %v3967_v13  ;;  %v1361_v0 = vpop.f32.mrf.mxu3  ;;  %v4040_v44 = vor.u32 %v3018_v29, %v2590_v31 }
 0x192   : > { %v4027_v48 = vpop.f32.mrf.mxu0 }
 0x193   : > { %v1362_v23 = vadd.f32 %v1361_v0, %v1273_v51  ;;  %4624 = vst [vmem:[#allocation47_spill] sm:$0xff] %v4040_v44  ;;  %1548 = vmatmul.bf16.gmra.mxu1 %v3810_v45  ;;  %v2838_v45 = vld [vmem:[#allocation5 + $0x188] sm:$0xf0] }
 0x195   : > { %v1794_v51 = vmax.f32 %v1362_v23, 0.0 }
 0x197   : > { %v1198_v29 = vpop.f32.mrf.mxu1 }
 0x198   : > { %v1274_v33 = vpop.f32.mrf.mxu2  ;;  %v4050_v23 = vadd.f32 %v1198_v29, %v1110_v62 }
 0x199   : > { %v1275_v21 = vadd.f32 %v1274_v33, %v1186_v20  ;;  %v1363_v61 = vpop.f32.mrf.mxu3  ;;  %v3065_v20 = vld [vmem:[#allocation5 + $0x104] sm:$0xf]  ;;  %v2841_v33 = vor.u32 %v3081_v40, %v2838_v45 }
 0x19a   : > { %v4038_v13 = vpop.f32.mrf.mxu0  ;;  %v2777_v43 = vor.u32 %v3065_v20, %v2774_v24 }
 0x19b   : > { %v1364_v17 = vadd.f32 %v1363_v61, %v1275_v21  ;;  %1700 = vmatpush.bf16.msra.mxu3 %v2841_v33 }
 0x19c   : > { %1611 = vmatpush.bf16.msra.mxu2 %v2777_v43 }
 0x19d   : > { %v1796_v0 = vmax.f32 %v1364_v17, 0.0  ;;  %1316 = vmatmul.bf16.gmra.mxu2 %v4036_v58  ;;  %1494 = vmatmul.bf16.gmra.mxu0 %v3650_v1  ;;  %v1102_v1 = vadd.f32 %v3839_v41, %v3725_v53  ;;  %v2606_v58 = vld [vmem:[%s3568_s6 + $0x1b8] sm:$0xf0] }
 0x19e   : > { %1405 = vmatmul.bf16.gmra.mxu3 %v4040_v44  ;;  %v2604_v44 = vld [vmem:[%s3568_s6 + $0x1a8] sm:$0xf] }
 0x19f   : > { %v4048_v31 = vpack.c.bf16 %v1796_v0, %v1794_v51  ;;  %v1191_v24 = vadd.f32 %v4006_v14, %v1102_v1  ;;  %v3024_v51 = vld [vmem:[%s3568_s6 + $0x1b4] sm:$0xf0]  ;;  %v3022_v0 = vld [vmem:[%s3568_s6 + $0x1ac] sm:$0xf]  ;;  %v4062_v62 = vpop.f32.mrf.mxu1  ;;  %v1115_v14 = vadd.f32 %v3902_v59, %v3725_v53  ;;  %v1107_v59 = vadd.f32 %v3865_v4, %v3725_v53 }
 0x1a0   : > { %v1277_v22 = vpop.f32.mrf.mxu2  ;;  %v4064_v41 = vor.u32 %v3024_v51, %v2604_v44  ;;  %v3100_v44 = vld [vmem:[#allocation8 + $0x18] sm:$0xff]  ;;  %v3099_v51 = vld [vmem:[#allocation8 + $0x10] sm:$0xff] }
 0x1a1   : > { %v1278_v21 = vadd.f32 %v1277_v22, %v3994_v63  ;;  %v1366_v61 = vpop.f32.mrf.mxu3  ;;  %v3101_v63 = vld [vmem:[#allocation8 + $0x20] sm:$0xff]  ;;  %v4066_v22 = vor.u32 %v3022_v0, %v2606_v58 }
 0x1a2   : > { %v4055_v17 = vpop.f32.mrf.mxu0  ;;  %2013 = vmatpush.bf16.msra.mxu0 %v3101_v63  ;;  %v3098_v63 = vld [vmem:[#allocation8 + $0x8] sm:$0xff] }
 0x1a3   : > { %v1367_v20 = vadd.f32 %v1366_v61, %v1278_v21  ;;  %1553 = vmatmul.bf16.gmra.mxu1 %v3836_v16 }
 0x1a5   : > { %v1798_v1 = vmax.f32 %v1367_v20, 0.0 }
 0x1a6   : > { %2014 = vmatpush.bf16.msra.mxu0 %v3100_v44 }
 0x1a7   : > { %v1203_v58 = vpop.f32.mrf.mxu1 }
 0x1a8   : > { %v1279_v40 = vpop.f32.mrf.mxu2 }
 0x1a9   : > { %v1280_v29 = vadd.f32 %v1279_v40, %v1191_v24  ;;  %v1368_v45 = vpop.f32.mrf.mxu3  ;;  %v4078_v24 = vadd.f32 %v1203_v58, %v1115_v14  ;;  %v2622_v14 = vld [vmem:[%s3568_s6 + $0x1d8] sm:$0xf0] }
 0x1aa   : > { %v4069_v33 = vpop.f32.mrf.mxu0  ;;  %2015 = vmatpush.bf16.msra.mxu0 %v3099_v51 }
 0x1ab   : > { %v1369_v43 = vadd.f32 %v1368_v45, %v1280_v29  ;;  %v1196_v29 = vadd.f32 %v4034_v12, %v1107_v59  ;;  %v3109_v45 = vld [vmem:[#allocation8 + $0x60] sm:$0xff] }
 0x1ac   : > { %2102 = vmatpush.bf16.msra.mxu1 %v3109_v45 }
 0x1ad   : > { %v1800_v21 = vmax.f32 %v1369_v43, 0.0  ;;  %1321 = vmatmul.bf16.gmra.mxu2 %v4064_v41  ;;  %1499 = vmatmul.bf16.gmra.mxu0 %v3665_v35  ;;  %v2620_v43 = vld [vmem:[%s3568_s6 + $0x1c8] sm:$0xf] }
 0x1ae   : > { %1410 = vmatmul.bf16.gmra.mxu3 %v4066_v22  ;;  %2016 = vmatpush.bf16.msra.mxu0 %v3098_v63  ;;  %v1112_v63 = vadd.f32 %v3891_v5, %v3725_v53 }
 0x1af   : > { %v4076_v16 = vpack.c.bf16 %v1800_v21, %v1798_v1  ;;  %v3028_v1 = vld [vmem:[%s3568_s6 + $0x1d4] sm:$0xf0]  ;;  %v3026_v21 = vld [vmem:[%s3568_s6 + $0x1cc] sm:$0xf] }
 0x1b0   : > { %v1282_v61 = vpop.f32.mrf.mxu2 }
 0x1b1   : > { %v1283_v20 = vadd.f32 %v1282_v61, %v4022_v42  ;;  %v1371_v35 = vpop.f32.mrf.mxu3  ;;  %v4090_v42 = vor.u32 %v3028_v1, %v2620_v43  ;;  %v3097_v61 = vld [vmem:[#allocation8] sm:$0xff] }
 0x1b2   : > { %v4083_v40 = vpop.f32.mrf.mxu0  ;;  %2017 = vmatpush.bf16.msra.mxu0 %v3097_v61  ;;  %v2638_v61 = vld [vmem:[%s3568_s6 + $0x1f8] sm:$0xf0] }
 0x1b3   : > { %v1372_v0 = vadd.f32 %v1371_v35, %v1283_v20  ;;  %v4092_v20 = vor.u32 %v3026_v21, %v2622_v14  ;;  %1558 = vmatmul.bf16.gmra.mxu1 %v3862_v47  ;;  %v4103_v47 = vperm.slane %v3718_v50, 1  ;;  %v1201_v14 = vadd.f32 %v4062_v62, %v1112_v63 }
 0x1b5   : > { %4625 = vst [vmem:[#allocation48_spill] sm:$0xff] %v4092_v20  ;;  %v1802_v12 = vmax.f32 %v1372_v0, 0.0  ;;  %v1438_v62 = vadd.f32 %v3945_v36, %v4103_v47 }
 0x1b8   : > { %v1284_v44 = vpop.f32.mrf.mxu2 }
 0x1b9   : > { %v1285_v4 = vadd.f32 %v1284_v44, %v1196_v29  ;;  %v1373_v58 = vpop.f32.mrf.mxu3  ;;  %v1205_v29 = vpop.f32.mrf.mxu1  ;;  %v2636_v44 = vld [vmem:[%s3568_s6 + $0x1e8] sm:$0xf] }
 0x1ba   : > { %v4098_v51 = vpop.f32.mrf.mxu0 }
 0x1bb   : > { %v1374_v35 = vadd.f32 %v1373_v58, %v1285_v4  ;;  %v3032_v4 = vld [vmem:[%s3568_s6 + $0x1f4] sm:$0xf0]  ;;  %v3030_v58 = vld [vmem:[%s3568_s6 + $0x1ec] sm:$0xf]  ;;  %s3356_s6 = scalar_lea.hbm %s4563_s5, 512 }
 0x1bc   : > { %p3358_p9 = scmp.lt.s32.totalorder %s3356_s6, %s3352_s15 }
 0x1bd   : > { %v1804_v59 = vmax.f32 %v1374_v35, 0.0  ;;  %1326 = vmatmul.bf16.gmra.mxu2 %v4090_v42  ;;  %1504 = vmatmul.bf16.gmra.mxu0 %v3680_v6  ;;  %v1436_v6 = vadd.f32 %v3928_v25, %v4103_v47 }
 0x1be   : > { %1415 = vmatmul.bf16.gmra.mxu3 %v4092_v20  ;;  %p3359_p2 = por %p3358_p9, %p3357_p11 }
 0x1bf   : > { %v4100_v45 = vpack.c.bf16 %v1804_v59, %v1802_v12 }
 0x1c0   : > { %v1287_v0 = vpop.f32.mrf.mxu2  ;;  %p3360_p10 = pnand %p3359_p2, %p3355_p8 }
 0x1c1   : > { %v1288_v43 = vadd.f32 %v1287_v0, %v4050_v23  ;;  %v1376_v1 = vpop.f32.mrf.mxu3  ;;  %v1524_v35 = vpop.f32.mrf.mxu1  ;;  %v4119_v23 = vor.u32 %v3032_v4, %v2636_v44  ;;  %v4121_v0 = vor.u32 %v3030_v58, %v2638_v61  ;;  %v3108_v61 = vld [vmem:[#allocation8 + $0x58] sm:$0xff] }
 0x1c2   : > { %v4115_v12 = vadd.f32 %v1524_v35, %v1436_v6  ;;  %v4117_v59 = vpop.f32.mrf.mxu0  ;;  %2103 = vmatpush.bf16.msra.mxu1 %v3108_v61 }
 0x1c3   : > { %v1377_v21 = vadd.f32 %v1376_v1, %v1288_v43  ;;  %1563 = vmatmul.bf16.gmra.mxu1 %v3592_v2  ;;  %v1117_v2 = vadd.f32 %v3917_v8, %v3725_v53  ;;  %v1443_v8 = vadd.f32 %v3972_v18, %v4103_v47 }
 0x1c5   : > { %v1806_v63 = vmax.f32 %v1377_v21, 0.0  ;;  %v1206_v58 = vadd.f32 %v1205_v29, %v1117_v2 }
 0x1c8   : > { %v1289_v50 = vpop.f32.mrf.mxu2 }
 0x1c9   : > { %v1290_v5 = vadd.f32 %v1289_v50, %v1201_v14  ;;  %v1378_v20 = vpop.f32.mrf.mxu3  ;;  %v1526_v1 = vpop.f32.mrf.mxu1 }
 0x1ca   : > { %v4131_v44 = vadd.f32 %v1526_v1, %v1438_v62  ;;  %v4136_v21 = vpop.f32.mrf.mxu0 }
 0x1cb   : > { %v1379_v25 = vadd.f32 %v1378_v20, %v1290_v5 }
 0x1cd   : > { %v1808_v43 = vmax.f32 %v1379_v25, 0.0  ;;  %1331 = vmatmul.bf16.gmra.mxu2 %v4119_v23  ;;  %1509 = vmatmul.bf16.gmra.mxu0 %v3700_v28  ;;  %v1441_v28 = vadd.f32 %v3955_v10, %v4103_v47 }
 0x1ce   : > { %1420 = vmatmul.bf16.gmra.mxu3 %v4121_v0 }
 0x1cf   : > { %v4129_v6 = vpack.c.bf16 %v1808_v43, %v1806_v63 }
 0x1d0   : > { %v1292_v14 = vpop.f32.mrf.mxu2 }
 0x1d1   : > { %v1293_v20 = vadd.f32 %v1292_v14, %v4078_v24  ;;  %v1381_v36 = vpop.f32.mrf.mxu3  ;;  %v1529_v35 = vpop.f32.mrf.mxu1 }
 0x1d2   : > { %v4140_v5 = vadd.f32 %v1529_v35, %v1441_v28  ;;  %v4145_v63 = vpop.f32.mrf.mxu0 }
 0x1d3   : > { %v1382_v4 = vadd.f32 %v1381_v36, %v1293_v20  ;;  %1568 = vmatmul.bf16.gmra.mxu1 %v3607_v19  ;;  %v1446_v20 = vadd.f32 %v3982_v54, %v4103_v47 }
 0x1d5   : > { %v1810_v24 = vmax.f32 %v1382_v4, 0.0 }
 0x1d8   : > { %v1294_v50 = vpop.f32.mrf.mxu2 }
 0x1d9   : > { %v1295_v25 = vadd.f32 %v1294_v50, %v1206_v58  ;;  %v1383_v62 = vpop.f32.mrf.mxu3  ;;  %v1531_v10 = vpop.f32.mrf.mxu1 }
 0x1da   : > { %v4152_v14 = vadd.f32 %v1531_v10, %v1443_v8  ;;  %v4157_v36 = vpop.f32.mrf.mxu0  ;;  %v1451_v8 = vadd.f32 %v4010_v27, %v4103_v47  ;;  %v4626_v27 = vld [vmem:[#allocation19_spill] sm:$0xff] }
 0x1db   : > { %v1384_v53 = vadd.f32 %v1383_v62, %v1295_v25 }
 0x1dd   : > { %v1812_v43 = vmax.f32 %v1384_v53, 0.0  ;;  %1612 = vmatmul.bf16.vlgmr.msra.gmra.mxu2 %v3716_v46  ;;  %2018 = vmatmul.bf16.vlgmr.msra.gmra.mxu0 %v3965_v3 }
 0x1de   : > { %1701 = vmatmul.bf16.vlgmr.msra.gmra.mxu3 %v3722_v52 }
 0x1df   : > { %v4150_v29 = vpack.c.bf16 %v1812_v43, %v1810_v24 }
 0x1e0   : > { %v1297_v1 = vpop.f32.mrf.mxu2 }
 0x1e1   : > { %v1298_v19 = vadd.f32 %v1297_v1, %v3738_v11  ;;  %v1386_v2 = vpop.f32.mrf.mxu3  ;;  %v1534_v46 = vpop.f32.mrf.mxu1  ;;  %v1448_v11 = vadd.f32 %v3999_v30, %v4103_v47 }
 0x1e2   : > { %v4159_v3 = vadd.f32 %v1534_v46, %v1446_v20  ;;  %v4172_v62 = vpop.f32.mrf.mxu0  ;;  %v4627_v20 = vld [vmem:[#allocation20_spill] sm:$0xff] }
 0x1e3   : > { %v1387_v18 = vadd.f32 %v1386_v2, %v1298_v19  ;;  %1573 = vmatmul.bf16.gmra.mxu1 %v3622_v34 }
 0x1e5   : > { %v1814_v61 = vmax.f32 %v1387_v18, 0.0 }
 0x1e8   : > { %v1299_v4 = vpop.f32.mrf.mxu2 }
 0x1e9   : > { %v1300_v52 = vadd.f32 %v1299_v4, %v3751_v39  ;;  %v1388_v28 = vpop.f32.mrf.mxu3  ;;  %v1536_v54 = vpop.f32.mrf.mxu1 }
 0x1ea   : > { %v4170_v39 = vadd.f32 %v1536_v54, %v1448_v11  ;;  %v4181_v1 = vpop.f32.mrf.mxu0 }
 0x1eb   : > { %v1389_v58 = vadd.f32 %v1388_v28, %v1300_v52 }
 0x1ed   : > { %v1816_v35 = vmax.f32 %v1389_v58, 0.0  ;;  %1617 = vmatmul.bf16.gmra.mxu2 %v3745_v26  ;;  %2023 = vmatmul.bf16.gmra.mxu0 %v3992_v60  ;;  %v3107_v26 = vld [vmem:[#allocation8 + $0x50] sm:$0xff] }
 0x1ee   : > { %1706 = vmatmul.bf16.gmra.mxu3 %v3749_v37  ;;  %2104 = vmatpush.bf16.msra.mxu1 %v3107_v26 }
 0x1ef   : > { %v4168_v50 = vpack.c.bf16 %v1816_v35, %v1814_v61 }
 0x1f0   : > { %v1302_v25 = vpop.f32.mrf.mxu2 }
 0x1f1   : > { %v1303_v34 = vadd.f32 %v1302_v25, %v3764_v55  ;;  %v1391_v53 = vpop.f32.mrf.mxu3  ;;  %v1539_v60 = vpop.f32.mrf.mxu1  ;;  %v1453_v55 = vadd.f32 %v4027_v48, %v4103_v47  ;;  %v1456_v48 = vadd.f32 %v4038_v13, %v4103_v47  ;;  %v4629_v25 = vld [vmem:[#allocation24_spill] sm:$0xff] }
 0x1f2   : > { %v4177_v37 = vadd.f32 %v1539_v60, %v1451_v8  ;;  %v4195_v61 = vpop.f32.mrf.mxu0 }
 0x1f3   : > { %v1392_v30 = vadd.f32 %v1391_v53, %v1303_v34  ;;  %1578 = vmatmul.bf16.gmra.mxu1 %v3637_v49  ;;  %v4628_v49 = vld [vmem:[#allocation21_spill] sm:$0xff] }
 0x1f5   : > { %v1818_v2 = vmax.f32 %v1392_v30, 0.0  ;;  %v4630_v30 = vld [vmem:[#allocation15_spill] sm:$0xff] }
 0x1f8   : > { %v1304_v24 = vpop.f32.mrf.mxu2 }
 0x1f9   : > { %v1305_v43 = vadd.f32 %v1304_v24, %v3777_v15  ;;  %v1393_v10 = vpop.f32.mrf.mxu3  ;;  %v1541_v46 = vpop.f32.mrf.mxu1  ;;  %v4631_v24 = vld [vmem:[#allocation22_spill] sm:$0xff] }
 0x1fa   : > { %v4190_v52 = vadd.f32 %v1541_v46, %v1453_v55  ;;  %v4204_v13 = vpop.f32.mrf.mxu0  ;;  %v1461_v46 = vadd.f32 %v4069_v33, %v4103_v47  ;;  %v4638_v33 = vld [vmem:[#allocation27_spill] sm:$0xff] }
 0x1fb   : > { %v1394_v19 = vadd.f32 %v1393_v10, %v1305_v43  ;;  %v4632_v43 = vld [vmem:[#allocation23_spill] sm:$0xff] }
 0x1fd   : > { %v1820_v18 = vmax.f32 %v1394_v19, 0.0  ;;  %1622 = vmatmul.bf16.gmra.mxu2 %v4626_v27  ;;  %2028 = vmatmul.bf16.gmra.mxu0 %v4020_v57 }
 0x1fe   : > { %1711 = vmatmul.bf16.gmra.mxu3 %v4627_v20 }
 0x1ff   : > { %v4188_v4 = vpack.c.bf16 %v1820_v18, %v1818_v2  ;;  %v4633_v2 = vld [vmem:[#allocation25_spill] sm:$0xff] }
 0x200   : > { %v1307_v15 = vpop.f32.mrf.mxu2 }
 0x201   : > { %v1308_v28 = vadd.f32 %v1307_v15, %v4628_v49  ;;  %v1396_v58 = vpop.f32.mrf.mxu3  ;;  %v1544_v35 = vpop.f32.mrf.mxu1  ;;  %v3106_v15 = vld [vmem:[#allocation8 + $0x48] sm:$0xff] }
 0x202   : > { %v4197_v57 = vadd.f32 %v1544_v35, %v1456_v48  ;;  %2105 = vmatpush.bf16.msra.mxu1 %v3106_v15 }
 0x203   : > { %v1397_v11 = vadd.f32 %v1396_v58, %v1308_v28  ;;  %1583 = vmatmul.bf16.gmra.mxu1 %v4630_v30  ;;  %v4215_v58 = vpop.f32.mrf.mxu0  ;;  %v4637_v30 = vld [vmem:[#allocation26_spill] sm:$0xff] }
 0x204   : > { %4634 = vst [vmem:[#allocation19_spill] sm:$0xff] %v4215_v58  ;;  %v4657_v58 = vld [vmem:[#allocation42_spill] sm:$0xff] }
 0x205   : > { %v1822_v26 = vmax.f32 %v1397_v11, 0.0  ;;  %v4635_v11 = vld [vmem:[#allocation28_spill] sm:$0xff] }
 0x208   : > { %v1309_v54 = vpop.f32.mrf.mxu2 }
 0x209   : > { %v1310_v34 = vadd.f32 %v1309_v54, %v4629_v25  ;;  %v1398_v53 = vpop.f32.mrf.mxu3  ;;  %v4206_v10 = vpop.f32.mrf.mxu1  ;;  %v4636_v54 = vld [vmem:[#allocation16_spill] sm:$0xff] }
 0x20b   : > { %v1399_v8 = vadd.f32 %v1398_v53, %v1310_v34 }
 0x20d   : > { %v1824_v60 = vmax.f32 %v1399_v8, 0.0  ;;  %1627 = vmatmul.bf16.gmra.mxu2 %v4631_v24  ;;  %2033 = vmatmul.bf16.gmra.mxu0 %v4048_v31  ;;  %v4639_v24 = vld [vmem:[#allocation29_spill] sm:$0xff] }
 0x20e   : > { %1716 = vmatmul.bf16.gmra.mxu3 %v4632_v43 }
 0x20f   : > { %v4208_v19 = vpack.c.bf16 %v1824_v60, %v1822_v26 }
 0x210   : > { %v1312_v55 = vpop.f32.mrf.mxu2 }
 0x211   : > { %v1313_v18 = vadd.f32 %v1312_v55, %v4633_v2  ;;  %v1401_v27 = vpop.f32.mrf.mxu3  ;;  %v1549_v49 = vpop.f32.mrf.mxu1 }
 0x212   : > { %v4213_v28 = vadd.f32 %v1549_v49, %v1461_v46  ;;  %v4227_v2 = vpop.f32.mrf.mxu0 }
 0x213   : > { %v1402_v20 = vadd.f32 %v1401_v27, %v1313_v18  ;;  %1588 = vmatmul.bf16.gmra.mxu1 %v4636_v54  ;;  %v1466_v27 = vadd.f32 %v4098_v51, %v4103_v47 }
 0x215   : > { %v1826_v34 = vmax.f32 %v1402_v20, 0.0 }
 0x218   : > { %v1314_v31 = vpop.f32.mrf.mxu2 }
 0x219   : > { %v1315_v48 = vadd.f32 %v1314_v31, %v4635_v11  ;;  %v1403_v35 = vpop.f32.mrf.mxu3  ;;  %v4222_v8 = vpop.f32.mrf.mxu1  ;;  %v4641_v11 = vld [vmem:[#allocation17_spill] sm:$0xff] }
 0x21b   : > { %v1404_v25 = vadd.f32 %v1403_v35, %v1315_v48  ;;  %v4235_v35 = vpop.f32.mrf.mxu0 }
 0x21c   : > { %4642 = vst [vmem:[#allocation20_spill] sm:$0xff] %v4235_v35 }
 0x21d   : > { %v1828_v53 = vmax.f32 %v1404_v25, 0.0  ;;  %1632 = vmatmul.bf16.gmra.mxu2 %v4637_v30  ;;  %2038 = vmatmul.bf16.gmra.mxu0 %v4076_v16  ;;  %v4640_v16 = vld [vmem:[#allocation32_spill] sm:$0xff] }
 0x21e   : > { %1721 = vmatmul.bf16.gmra.mxu3 %v4638_v33 }
 0x21f   : > { %v4224_v26 = vpack.c.bf16 %v1828_v53, %v1826_v34  ;;  %v4643_v34 = vld [vmem:[#allocation30_spill] sm:$0xff]  ;;  %v4644_v53 = vld [vmem:[#allocation31_spill] sm:$0xff] }
 0x220   : > { %v1317_v60 = vpop.f32.mrf.mxu2 }
 0x221   : > { %v1318_v43 = vadd.f32 %v1317_v60, %v4639_v24  ;;  %v1406_v55 = vpop.f32.mrf.mxu3  ;;  %v1554_v20 = vpop.f32.mrf.mxu1  ;;  %v4645_v60 = vld [vmem:[#allocation33_spill] sm:$0xff] }
 0x222   : > { %v4231_v15 = vadd.f32 %v1554_v20, %v1466_v27  ;;  %v1471_v27 = vadd.f32 %v4136_v21, %v4103_v47  ;;  %v4649_v21 = vld [vmem:[#allocation35_spill] sm:$0xff] }
 0x223   : > { %v1407_v18 = vadd.f32 %v1406_v55, %v1318_v43  ;;  %1593 = vmatmul.bf16.gmra.mxu1 %v4641_v11  ;;  %v4247_v20 = vpop.f32.mrf.mxu0 }
 0x225   : > { %v1830_v54 = vmax.f32 %v1407_v18, 0.0  ;;  %v3105_v18 = vld [vmem:[#allocation8 + $0x40] sm:$0xff] }
 0x226   : > { %2106 = vmatpush.bf16.msra.mxu1 %v3105_v18 }
 0x228   : > { %v1319_v46 = vpop.f32.mrf.mxu2 }
 0x229   : > { %v1320_v49 = vadd.f32 %v1319_v46, %v4640_v16  ;;  %v1408_v31 = vpop.f32.mrf.mxu3  ;;  %v4240_v51 = vpop.f32.mrf.mxu1 }
 0x22b   : > { %v1409_v48 = vadd.f32 %v1408_v31, %v1320_v49  ;;  %v4646_v49 = vld [vmem:[#allocation36_spill] sm:$0xff] }
 0x22d   : > { %v1832_v25 = vmax.f32 %v1409_v48, 0.0  ;;  %1637 = vmatmul.bf16.gmra.mxu2 %v4643_v34  ;;  %2043 = vmatmul.bf16.gmra.mxu0 %v4100_v45  ;;  %v4647_v48 = vld [vmem:[#allocation18_spill] sm:$0xff] }
 0x22e   : > { %1726 = vmatmul.bf16.gmra.mxu3 %v4644_v53  ;;  %v4648_v53 = vld [vmem:[#allocation34_spill] sm:$0xff] }
 0x22f   : > { %v4242_v30 = vpack.c.bf16 %v1832_v25, %v1830_v54 }
 0x230   : > { %v1322_v33 = vpop.f32.mrf.mxu2 }
 0x231   : > { %v1323_v24 = vadd.f32 %v1322_v33, %v4645_v60  ;;  %v1411_v43 = vpop.f32.mrf.mxu3  ;;  %v1559_v46 = vpop.f32.mrf.mxu1 }
 0x232   : > { %v4249_v16 = vadd.f32 %v1559_v46, %v1471_v27  ;;  %v4651_v27 = vld [vmem:[#allocation37_spill] sm:$0xff] }
 0x233   : > { %v1412_v55 = vadd.f32 %v1411_v43, %v1323_v24  ;;  %1598 = vmatmul.bf16.gmra.mxu1 %v4647_v48  ;;  %v4260_v43 = vpop.f32.mrf.mxu0 }
 0x234   : > { %4650 = vst [vmem:[#allocation21_spill] sm:$0xff] %v4260_v43  ;;  %v4653_v43 = vld [vmem:[#allocation38_spill] sm:$0xff] }
 0x235   : > { %v1834_v25 = vmax.f32 %v1412_v55, 0.0  ;;  %v1476_v55 = vadd.f32 %v4157_v36, %v4103_v47 }
 0x238   : > { %v1324_v45 = vpop.f32.mrf.mxu2 }
 0x239   : > { %v1325_v31 = vadd.f32 %v1324_v45, %v4646_v49  ;;  %v1413_v11 = vpop.f32.mrf.mxu3  ;;  %v4256_v33 = vpop.f32.mrf.mxu1 }
 0x23b   : > { %v1414_v54 = vadd.f32 %v1413_v11, %v1325_v31 }
 0x23d   : > { %v1836_v34 = vmax.f32 %v1414_v54, 0.0  ;;  %1642 = vmatmul.bf16.gmra.mxu2 %v4648_v53  ;;  %2048 = vmatmul.bf16.gmra.mxu0 %v4129_v6  ;;  %v4652_v6 = vld [vmem:[#allocation40_spill] sm:$0xff]  ;;  %v4268_v53 = vpop.f32.mrf.mxu0 }
 0x23e   : > { %1731 = vmatmul.bf16.gmra.mxu3 %v4649_v21 }
 0x23f   : > { %v4258_v60 = vpack.c.bf16 %v1836_v34, %v1834_v25 }
 0x240   : > { %v1327_v24 = vpop.f32.mrf.mxu2 }
 0x241   : > { %v1328_v18 = vadd.f32 %v1327_v24, %v4651_v27  ;;  %v1416_v46 = vpop.f32.mrf.mxu3  ;;  %v1564_v49 = vpop.f32.mrf.mxu1  ;;  %v4654_v24 = vld [vmem:[#allocation39_spill] sm:$0xff] }
 0x242   : > { %v4265_v11 = vadd.f32 %v1564_v49, %v1476_v55 }
 0x243   : > { %v1417_v45 = vadd.f32 %v1416_v46, %v1328_v18  ;;  %v4655_v46 = vld [vmem:[#allocation41_spill] sm:$0xff] }
 0x245   : > { %v1838_v34 = vmax.f32 %v1417_v45, 0.0  ;;  %v4280_v45 = vpop.f32.mrf.mxu0 }
 0x248   : > { %v1329_v31 = vpop.f32.mrf.mxu2 }
 0x249   : > { %v1330_v48 = vadd.f32 %v1329_v31, %v4652_v6  ;;  %v1418_v54 = vpop.f32.mrf.mxu3  ;;  %v4273_v27 = vpop.f32.mrf.mxu1  ;;  %v1481_v6 = vadd.f32 %v4181_v1, %v4103_v47 }
 0x24b   : > { %v1419_v25 = vadd.f32 %v1418_v54, %v1330_v48 }
 0x24d   : > { %v1840_v21 = vmax.f32 %v1419_v25, 0.0  ;;  %1647 = vmatmul.bf16.gmra.mxu2 %v4653_v43  ;;  %2053 = vmatmul.bf16.gmra.mxu0 %v4150_v29  ;;  %v4656_v29 = vld [vmem:[#allocation44_spill] sm:$0xff] }
 0x24e   : > { %1736 = vmatmul.bf16.gmra.mxu3 %v4654_v24 }
 0x24f   : > { %v4275_v36 = vpack.c.bf16 %v1840_v21, %v1838_v34 }
 0x250   : > { %v1332_v18 = vpop.f32.mrf.mxu2 }
 0x251   : > { %v1333_v55 = vadd.f32 %v1332_v18, %v4655_v46  ;;  %v1421_v49 = vpop.f32.mrf.mxu3  ;;  %v1569_v48 = vpop.f32.mrf.mxu1  ;;  %v4658_v18 = vld [vmem:[#allocation43_spill] sm:$0xff] }
 0x252   : > { %v4282_v54 = vadd.f32 %v1569_v48, %v1481_v6  ;;  %v4288_v46 = vpop.f32.mrf.mxu0  ;;  %v1486_v48 = vadd.f32 %v4204_v13, %v4103_v47 }
 0x253   : > { %v1422_v31 = vadd.f32 %v1421_v49, %v1333_v55 }
 0x255   : > { %v1842_v34 = vmax.f32 %v1422_v31, 0.0 }
 0x258   : > { %v1334_v43 = vpop.f32.mrf.mxu2 }
 0x259   : > { %v1335_v25 = vadd.f32 %v1334_v43, %v4656_v29  ;;  %v1423_v24 = vpop.f32.mrf.mxu3  ;;  %v4290_v1 = vpop.f32.mrf.mxu1 }
 0x25b   : > { %v1424_v35 = vadd.f32 %v1423_v24, %v1335_v25 }
 0x25d   : > { %v1844_v21 = vmax.f32 %v1424_v35, 0.0  ;;  %1652 = vmatmul.bf16.gmra.mxu2 %v4657_v58  ;;  %2058 = vmatmul.bf16.gmra.mxu0 %v4168_v50  ;;  %v4299_v50 = vpop.f32.mrf.mxu0 }
 0x25e   : > { %1741 = vmatmul.bf16.gmra.mxu3 %v4658_v18 }
 0x25f   : > { %v4292_v55 = vpack.c.bf16 %v1844_v21, %v1842_v34 }
 0x260   : > { %v1613_v49 = vpop.f32.mrf.mxu2 }
 0x261   : > { %v1702_v6 = vpop.f32.mrf.mxu3  ;;  %v1614_v31 = vadd.f32 %v1613_v49, %v4115_v12  ;;  %v1574_v35 = vpop.f32.mrf.mxu1 }
 0x262   : > { %v4297_v58 = vadd.f32 %v1574_v35, %v1486_v48 }
 0x263   : > { %v1703_v29 = vadd.f32 %v1702_v6, %v1614_v31 }
 0x265   : > { %v1783_v34 = vmax.f32 %v1703_v29, 0.0  ;;  %v4307_v35 = vpop.f32.mrf.mxu0 }
 0x268   : > { %v1615_v43 = vpop.f32.mrf.mxu2 }
 0x269   : > { %v1616_v25 = vadd.f32 %v1615_v43, %v4131_v44  ;;  %v1704_v24 = vpop.f32.mrf.mxu3  ;;  %v4305_v13 = vpop.f32.mrf.mxu1  ;;  %v1491_v44 = vadd.f32 %v4227_v2, %v4103_v47  ;;  %v4659_v2 = vld [vmem:[#allocation45_spill] sm:$0xff] }
 0x26b   : > { %v1705_v18 = vadd.f32 %v1704_v24, %v1616_v25 }
 0x26d   : > { %v1785_v21 = vmax.f32 %v1705_v18, 0.0  ;;  %1657 = vmatmul.bf16.gmra.mxu2 %v3953_v38  ;;  %2063 = vmatmul.bf16.gmra.mxu0 %v4188_v4  ;;  %v4315_v24 = vpop.f32.mrf.mxu0 }
 0x26e   : > { %1746 = vmatmul.bf16.gmra.mxu3 %v3957_v9 }
 0x26f   : > { %v1847_v12 = vpack.c.bf16 %v1785_v21, %v1783_v34 }
 0x270   : > { %v1618_v49 = vpop.f32.mrf.mxu2 }
 0x271   : > { %v1707_v48 = vpop.f32.mrf.mxu3  ;;  %2107 = vmatmul.bf16.vlgmr.msra.gmra.mxu1 %v1847_v12  ;;  %v1619_v6 = vadd.f32 %v1618_v49, %v4140_v5  ;;  %v1579_v31 = vpop.f32.mrf.mxu1 }
 0x272   : > { %v4312_v38 = vadd.f32 %v1579_v31, %v1491_v44 }
 0x273   : > { %v1708_v4 = vadd.f32 %v1707_v48, %v1619_v6 }
 0x275   : > { %v1787_v18 = vmax.f32 %v1708_v4, 0.0  ;;  %v4325_v44 = vpop.f32.mrf.mxu0 }
 0x278   : > { %v1620_v43 = vpop.f32.mrf.mxu2 }
 0x279   : > { %v1621_v9 = vadd.f32 %v1620_v43, %v4152_v14  ;;  %v1709_v29 = vpop.f32.mrf.mxu3  ;;  %v4320_v21 = vpop.f32.mrf.mxu1  ;;  %v1496_v14 = vadd.f32 %v4247_v20, %v4103_v47 }
 0x27b   : > { %v1710_v25 = vadd.f32 %v1709_v29, %v1621_v9 }
 0x27d   : > { %v1789_v34 = vmax.f32 %v1710_v25, 0.0  ;;  %1662 = vmatmul.bf16.gmra.mxu2 %v3980_v7  ;;  %2068 = vmatmul.bf16.gmra.mxu0 %v4208_v19 }
 0x27e   : > { %1751 = vmatmul.bf16.gmra.mxu3 %v4659_v2 }
 0x27f   : > { %v1849_v5 = vpack.c.bf16 %v1789_v34, %v1787_v18  ;;  %v4335_v34 = vpop.f32.mrf.mxu0 }
 0x280   : > { %v1623_v12 = vpop.f32.mrf.mxu2 }
 0x281   : > { %v1712_v49 = vpop.f32.mrf.mxu3  ;;  %2112 = vmatmul.bf16.gmra.mxu1 %v1849_v5  ;;  %v1624_v48 = vadd.f32 %v1623_v12, %v4159_v3  ;;  %v1584_v6 = vpop.f32.mrf.mxu1 }
 0x282   : > { %v4327_v7 = vadd.f32 %v1584_v6, %v1496_v14 }
 0x283   : > { %v1713_v19 = vadd.f32 %v1712_v49, %v1624_v48 }
 0x285   : > { %v1791_v29 = vmax.f32 %v1713_v19, 0.0 }
 0x287   : > { %v4343_v48 = vpop.f32.mrf.mxu0 }
 0x288   : > { %v1625_v31 = vpop.f32.mrf.mxu2 }
 0x289   : > { %v1626_v43 = vadd.f32 %v1625_v31, %v4170_v39  ;;  %v1714_v4 = vpop.f32.mrf.mxu3  ;;  %v4333_v20 = vpop.f32.mrf.mxu1  ;;  %v1501_v39 = vadd.f32 %v4268_v53, %v4103_v47  ;;  %v4661_v53 = vld [vmem:[#allocation47_spill] sm:$0xff] }
 0x28b   : > { %v1715_v9 = vadd.f32 %v1714_v4, %v1626_v43  ;;  %v4660_v43 = vld [vmem:[#allocation46_spill] sm:$0xff] }
 0x28d   : > { %v1793_v25 = vmax.f32 %v1715_v9, 0.0  ;;  %1667 = vmatmul.bf16.gmra.mxu2 %v4008_v56  ;;  %2073 = vmatmul.bf16.gmra.mxu0 %v4224_v26 }
 0x28e   : > { %1756 = vmatmul.bf16.gmra.mxu3 %v4012_v32 }
 0x28f   : > { %v1851_v3 = vpack.c.bf16 %v1793_v25, %v1791_v29  ;;  %v1506_v25 = vadd.f32 %v4288_v46, %v4103_v47 }
 0x290   : > { %v1628_v18 = vpop.f32.mrf.mxu2 }
 0x291   : > { %v1717_v2 = vpop.f32.mrf.mxu3  ;;  %2117 = vmatmul.bf16.gmra.mxu1 %v1851_v3  ;;  %v1629_v5 = vadd.f32 %v1628_v18, %v4177_v37  ;;  %v1589_v12 = vpop.f32.mrf.mxu1 }
 0x292   : > { %v4340_v56 = vadd.f32 %v1589_v12, %v1501_v39  ;;  %v4354_v3 = vpop.f32.mrf.mxu0 }
 0x293   : > { %v1718_v26 = vadd.f32 %v1717_v2, %v1629_v5 }
 0x295   : > { %v1795_v31 = vmax.f32 %v1718_v26, 0.0 }
 0x298   : > { %v1630_v49 = vpop.f32.mrf.mxu2 }
 0x299   : > { %v1631_v32 = vadd.f32 %v1630_v49, %v4190_v52  ;;  %v1719_v14 = vpop.f32.mrf.mxu3  ;;  %v4348_v4 = vpop.f32.mrf.mxu1  ;;  %v1458_v52 = vadd.f32 %v4055_v17, %v4103_v47 }
 0x29a   : > { %v4363_v17 = vpop.f32.mrf.mxu0 }
 0x29b   : > { %v1720_v6 = vadd.f32 %v1719_v14, %v1631_v32 }
 0x29d   : > { %v1797_v19 = vmax.f32 %v1720_v6, 0.0  ;;  %1672 = vmatmul.bf16.gmra.mxu2 %v4660_v43  ;;  %2078 = vmatmul.bf16.gmra.mxu0 %v4242_v30  ;;  %v1547_v30 = vadd.f32 %v4206_v10, %v1458_v52  ;;  %v1511_v43 = vadd.f32 %v4307_v35, %v4103_v47 }
 0x29e   : > { %1761 = vmatmul.bf16.gmra.mxu3 %v4661_v53 }
 0x29f   : > { %v1853_v37 = vpack.c.bf16 %v1797_v19, %v1795_v31  ;;  %v1463_v19 = vadd.f32 %v4083_v40, %v4103_v47  ;;  %v4662_v40 = vld [vmem:[#allocation48_spill] sm:$0xff] }
 0x2a0   : > { %v1633_v9 = vpop.f32.mrf.mxu2 }
 0x2a1   : > { %v1722_v29 = vpop.f32.mrf.mxu3  ;;  %2122 = vmatmul.bf16.gmra.mxu1 %v1853_v37  ;;  %v1634_v18 = vadd.f32 %v1633_v9, %v4197_v57  ;;  %v1594_v2 = vpop.f32.mrf.mxu1 }
 0x2a2   : > { %v4358_v5 = vadd.f32 %v1594_v2, %v1506_v25  ;;  %v4375_v9 = vpop.f32.mrf.mxu0 }
 0x2a3   : > { %v1723_v12 = vadd.f32 %v1722_v29, %v1634_v18 }
 0x2a5   : > { %v1799_v14 = vmax.f32 %v1723_v12, 0.0 }
 0x2a8   : > { %v1635_v39 = vpop.f32.mrf.mxu2 }
 0x2a9   : > { %v1636_v49 = vadd.f32 %v1635_v39, %v1547_v30  ;;  %v1724_v26 = vpop.f32.mrf.mxu3  ;;  %v4365_v10 = vpop.f32.mrf.mxu1  ;;  %v1468_v39 = vadd.f32 %v4117_v59, %v4103_v47 }
 0x2aa   : > { %v4382_v12 = vpop.f32.mrf.mxu0 }
 0x2ab   : > { %v1725_v32 = vadd.f32 %v1724_v26, %v1636_v49  ;;  %v1557_v26 = vadd.f32 %v4240_v51, %v1468_v39  ;;  %v1473_v51 = vadd.f32 %v4145_v63, %v4103_v47 }
 0x2ad   : > { %v1801_v6 = vmax.f32 %v1725_v32, 0.0  ;;  %1677 = vmatmul.bf16.gmra.mxu2 %v4064_v41  ;;  %2083 = vmatmul.bf16.gmra.mxu0 %v4258_v60  ;;  %v1552_v60 = vadd.f32 %v4222_v8, %v1463_v19 }
 0x2ae   : > { %1766 = vmatmul.bf16.gmra.mxu3 %v4066_v22 }
 0x2af   : > { %v1855_v57 = vpack.c.bf16 %v1801_v6, %v1799_v14 }
 0x2b0   : > { %v1638_v46 = vpop.f32.mrf.mxu2 }
 0x2b1   : > { %v1727_v31 = vpop.f32.mrf.mxu3  ;;  %2127 = vmatmul.bf16.gmra.mxu1 %v1855_v57  ;;  %v1639_v41 = vadd.f32 %v1638_v46, %v4213_v28  ;;  %v1599_v53 = vpop.f32.mrf.mxu1 }
 0x2b2   : > { %v4373_v37 = vadd.f32 %v1599_v53, %v1511_v43  ;;  %v4386_v57 = vpop.f32.mrf.mxu0 }
 0x2b3   : > { %v1728_v29 = vadd.f32 %v1727_v31, %v1639_v41  ;;  %v1562_v41 = vadd.f32 %v4256_v33, %v1473_v51 }
 0x2b5   : > { %v1803_v30 = vmax.f32 %v1728_v29, 0.0 }
 0x2b8   : > { %v1640_v22 = vpop.f32.mrf.mxu2 }
 0x2b9   : > { %v1641_v52 = vadd.f32 %v1640_v22, %v1552_v60  ;;  %v1729_v25 = vpop.f32.mrf.mxu3 }
 0x2bb   : > { %v1730_v18 = vadd.f32 %v1729_v25, %v1641_v52 }
 0x2bd   : > { %v1805_v2 = vmax.f32 %v1730_v18, 0.0  ;;  %1682 = vmatmul.bf16.gmra.mxu2 %v4090_v42  ;;  %2088 = vmatmul.bf16.gmra.mxu0 %v4275_v36 }
 0x2be   : > { %1771 = vmatmul.bf16.gmra.mxu3 %v4662_v40  ;;  %v4404_v40 = vld [vmem:[%s4562_s4] ss:$0 sm:$0xff] }
 0x2bf   : > { %v1857_v28 = vpack.c.bf16 %v1805_v2, %v1803_v30  ;;  %v1478_v30 = vadd.f32 %v4172_v62, %v4103_v47 }
 0x2c0   : > { %v1643_v8 = vpop.f32.mrf.mxu2 }
 0x2c1   : > { %v1732_v35 = vpop.f32.mrf.mxu3  ;;  %2132 = vmatmul.bf16.gmra.mxu1 %v1857_v28  ;;  %v1644_v49 = vadd.f32 %v1643_v8, %v4231_v15  ;;  %v1567_v33 = vadd.f32 %v4273_v27, %v1478_v30  ;;  %v2027_v30 = vadd.f32 %v4404_v40, %v4354_v3 }
 0x2c3   : > { %v1733_v14 = vadd.f32 %v1732_v35, %v1644_v49  ;;  %v2020_v49 = vadd.f32 %v4404_v40, %v4325_v44  ;;  %v2022_v44 = vadd.f32 %v4404_v40, %v4335_v34 }
 0x2c5   : > { %v1807_v46 = vmax.f32 %v1733_v14, 0.0 }
 0x2c8   : > { %v1645_v32 = vpop.f32.mrf.mxu2 }
 0x2c9   : > { %v1646_v42 = vadd.f32 %v1645_v32, %v1557_v26  ;;  %v1734_v6 = vpop.f32.mrf.mxu3 }
 0x2cb   : > { %v1735_v36 = vadd.f32 %v1734_v6, %v1646_v42 }
 0x2cd   : > { %v1809_v31 = vmax.f32 %v1735_v36, 0.0  ;;  %1687 = vmatmul.bf16.gmra.mxu2 %v4119_v23  ;;  %2093 = vmatmul.bf16.gmra.mxu0 %v4292_v55  ;;  %v1483_v36 = vadd.f32 %v4195_v61, %v4103_v47 }
 0x2ce   : > { %1776 = vmatmul.bf16.gmra.mxu3 %v4121_v0 }
 0x2cf   : > { %v1859_v59 = vpack.c.bf16 %v1809_v31, %v1807_v46 }
 0x2d0   : > { %v1648_v19 = vpop.f32.mrf.mxu2 }
 0x2d1   : > { %v1737_v15 = vpop.f32.mrf.mxu3  ;;  %2137 = vmatmul.bf16.gmra.mxu1 %v1859_v59  ;;  %v1649_v43 = vadd.f32 %v1648_v19, %v4249_v16  ;;  %v4398_v16 = vpop.f32.mrf.mxu1  ;;  %v1572_v59 = vadd.f32 %v4290_v1, %v1483_v36 }
 0x2d3   : > { %v1738_v53 = vadd.f32 %v1737_v15, %v1649_v43 }
 0x2d5   : > { %v1811_v52 = vmax.f32 %v1738_v53, 0.0  ;;  %v4419_v53 = vpop.f32.mrf.mxu0 }
 0x2d8   : > { %v1650_v60 = vpop.f32.mrf.mxu2 }
 0x2d9   : > { %v1651_v22 = vadd.f32 %v1650_v60, %v1562_v41  ;;  %v1739_v29 = vpop.f32.mrf.mxu3 }
 0x2db   : > { %v1740_v23 = vadd.f32 %v1739_v29, %v1651_v22  ;;  %v2025_v22 = vadd.f32 %v4404_v40, %v4343_v48 }
 0x2dd   : > { %v1813_v55 = vmax.f32 %v1740_v23, 0.0  ;;  %v4429_v48 = vpop.f32.mrf.mxu0 }
 0x2df   : > { %v1861_v25 = vpack.c.bf16 %v1813_v55, %v1811_v52 }
 0x2e0   : > { %v1653_v0 = vpop.f32.mrf.mxu2 }
 0x2e1   : > { %v1742_v18 = vpop.f32.mrf.mxu3  ;;  %2142 = vmatmul.bf16.gmra.mxu1 %v1861_v25  ;;  %v1654_v63 = vadd.f32 %v1653_v0, %v4265_v11  ;;  %v4663_v0 = vld [vmem:[#allocation19_spill] sm:$0xff] }
 0x2e3   : > { %v1743_v28 = vadd.f32 %v1742_v18, %v1654_v63  ;;  %v1488_v18 = vadd.f32 %v4663_v0, %v4103_v47 }
 0x2e5   : > { %v1815_v62 = vmax.f32 %v1743_v28, 0.0 }
 0x2e8   : > { %v1655_v2 = vpop.f32.mrf.mxu2 }
 0x2e9   : > { %v1656_v8 = vadd.f32 %v1655_v2, %v1567_v33  ;;  %v1744_v35 = vpop.f32.mrf.mxu3  ;;  %v1577_v2 = vadd.f32 %v4305_v13, %v1488_v18 }
 0x2eb   : > { %v1745_v39 = vadd.f32 %v1744_v35, %v1656_v8 }
 0x2ed   : > { %v1817_v26 = vmax.f32 %v1745_v39, 0.0 }
 0x2ee   : > { %v2108_v11 = vpop.f32.mrf.mxu1 }
 0x2ef   : > { %v1863_v32 = vpack.c.bf16 %v1817_v26, %v1815_v62  ;;  %v2109_v14 = vadd.f32 %v2108_v11, %v2020_v49  ;;  %v2030_v11 = vadd.f32 %v4404_v40, %v4363_v17 }
 0x2f0   : > { %v1658_v27 = vpop.f32.mrf.mxu2 }
 0x2f1   : > { %v2188_v42 = vmax.f32 %v2109_v14, 0.0  ;;  %v1747_v6 = vpop.f32.mrf.mxu3  ;;  %2147 = vmatmul.bf16.gmra.mxu1 %v1863_v32  ;;  %v1659_v46 = vadd.f32 %v1658_v27, %v4282_v54 }
 0x2f3   : > { %2220 = vst [vmem:[%s4411_s23] sm:$0xff] %v2188_v42  ;;  %v1748_v51 = vadd.f32 %v1747_v6, %v1659_v46  ;;  %v4435_v42 = vpop.f32.mrf.mxu0 }
 0x2f5   : > { %v1819_v34 = vmax.f32 %v1748_v51, 0.0 }
 0x2f6   : > { %v2110_v31 = vpop.f32.mrf.mxu1 }
 0x2f7   : > { %v2111_v19 = vadd.f32 %v2110_v31, %v2022_v44  ;;  %v4664_v44 = vld [vmem:[#allocation20_spill] sm:$0xff]  ;;  %v2032_v31 = vadd.f32 %v4404_v40, %v4375_v9 }
 0x2f8   : > { %v1660_v15 = vpop.f32.mrf.mxu2  ;;  %v1493_v46 = vadd.f32 %v4664_v44, %v4103_v47 }
 0x2f9   : > { %v2189_v43 = vmax.f32 %v2111_v19, 0.0  ;;  %v1661_v41 = vadd.f32 %v1660_v15, %v1572_v59  ;;  %v1749_v61 = vpop.f32.mrf.mxu3 }
 0x2fa   : > { %v1582_v19 = vadd.f32 %v4320_v21, %v1493_v46 }
 0x2fb   : > { %2221 = vst [vmem:[%s4411_s23 + $0x8] sm:$0xff] %v2189_v43  ;;  %v1750_v60 = vadd.f32 %v1749_v61, %v1661_v41 }
 0x2fd   : > { %v1821_v29 = vmax.f32 %v1750_v60, 0.0 }
 0x2fe   : > { %v2113_v54 = vpop.f32.mrf.mxu1 }
 0x2ff   : > { %v1865_v23 = vpack.c.bf16 %v1821_v29, %v1819_v34  ;;  %v2114_v52 = vadd.f32 %v2113_v54, %v2025_v22  ;;  %v4444_v22 = vpop.f32.mrf.mxu0  ;;  %v2035_v29 = vadd.f32 %v4404_v40, %v4382_v12 }
 0x300   : > { %v1663_v1 = vpop.f32.mrf.mxu2 }
 0x301   : > { %v2190_v55 = vmax.f32 %v2114_v52, 0.0  ;;  %v1752_v25 = vpop.f32.mrf.mxu3  ;;  %2152 = vmatmul.bf16.gmra.mxu1 %v1865_v23  ;;  %v1664_v63 = vadd.f32 %v1663_v1, %v4297_v58 }
 0x303   : > { %2222 = vst [vmem:[%s4411_s23 + $0x10] sm:$0xff] %v2190_v55  ;;  %v1753_v35 = vadd.f32 %v1752_v25, %v1664_v63  ;;  %v4665_v25 = vld [vmem:[#allocation21_spill] sm:$0xff] }
 0x304   : > { %v1498_v0 = vadd.f32 %v4665_v25, %v4103_v47 }
 0x305   : > { %v1823_v3 = vmax.f32 %v1753_v35, 0.0 }
 0x306   : > { %v2115_v33 = vpop.f32.mrf.mxu1 }
 0x307   : > { %v2116_v28 = vadd.f32 %v2115_v33, %v2027_v30  ;;  %v4452_v18 = vpop.f32.mrf.mxu0  ;;  %v2037_v30 = vadd.f32 %v4404_v40, %v4386_v57  ;;  %v1587_v33 = vadd.f32 %v4333_v20, %v1498_v0 }
 0x308   : > { %v1665_v8 = vpop.f32.mrf.mxu2 }
 0x309   : > { %v2191_v39 = vmax.f32 %v2116_v28, 0.0  ;;  %v1666_v49 = vadd.f32 %v1665_v8, %v1577_v2  ;;  %v1754_v62 = vpop.f32.mrf.mxu3 }
 0x30b   : > { %2223 = vst [vmem:[%s4411_s23 + $0x18] sm:$0xff] %v2191_v39  ;;  %v1755_v26 = vadd.f32 %v1754_v62, %v1666_v49 }
 0x30d   : > { %v1825_v32 = vmax.f32 %v1755_v26, 0.0  ;;  %v2040_v26 = vadd.f32 %v4404_v40, %v4419_v53 }
 0x30e   : > { %v2118_v58 = vpop.f32.mrf.mxu1 }
 0x30f   : > { %v1867_v14 = vpack.c.bf16 %v1825_v32, %v1823_v3  ;;  %v2119_v27 = vadd.f32 %v2118_v58, %v2030_v11  ;;  %v2051_v57 = vpop.f32.mrf.mxu0 }
 0x310   : > { %v1668_v13 = vpop.f32.mrf.mxu2 }
 0x311   : > { %v2192_v6 = vmax.f32 %v2119_v27, 0.0  ;;  %v1757_v36 = vpop.f32.mrf.mxu3  ;;  %2157 = vmatmul.bf16.gmra.mxu1 %v1867_v14  ;;  %v1669_v17 = vadd.f32 %v1668_v13, %v4312_v38  ;;  %v1503_v13 = vadd.f32 %v4280_v45, %v4103_v47  ;;  %v2045_v45 = vadd.f32 %v4404_v40, %v4435_v42 }
 0x313   : > { %2224 = vst [vmem:[%s4411_s23 + $0x20] sm:$0xff] %v2192_v6  ;;  %v1758_v43 = vadd.f32 %v1757_v36, %v1669_v17  ;;  %v2042_v6 = vadd.f32 %v4404_v40, %v4429_v48  ;;  %v1592_v44 = vadd.f32 %v4348_v4, %v1503_v13 }
 0x315   : > { %v1827_v9 = vmax.f32 %v1758_v43, 0.0 }
 0x316   : > { %v2120_v59 = vpop.f32.mrf.mxu1 }
 0x317   : > { %v2121_v15 = vadd.f32 %v2120_v59, %v2032_v31  ;;  %v2054_v31 = vpop.f32.mrf.mxu0 }
 0x318   : > { %v1670_v51 = vpop.f32.mrf.mxu2 }
 0x319   : > { %v2193_v41 = vmax.f32 %v2121_v15, 0.0  ;;  %v1671_v61 = vadd.f32 %v1670_v51, %v1582_v19  ;;  %v1759_v60 = vpop.f32.mrf.mxu3 }
 0x31b   : > { %2225 = vst [vmem:[%s4411_s23 + $0x28] sm:$0xff] %v2193_v41  ;;  %v1760_v34 = vadd.f32 %v1759_v60, %v1671_v61 }
 0x31d   : > { %v1829_v54 = vmax.f32 %v1760_v34, 0.0 }
 0x31e   : > { %v2123_v38 = vpop.f32.mrf.mxu1 }
 0x31f   : > { %v1869_v23 = vpack.c.bf16 %v1829_v54, %v1827_v9  ;;  %v2124_v52 = vadd.f32 %v2123_v38, %v2035_v29  ;;  %v2056_v9 = vpop.f32.mrf.mxu0  ;;  %v1508_v54 = vadd.f32 %v4299_v50, %v4103_v47  ;;  %v2047_v38 = vadd.f32 %v4404_v40, %v4444_v22 }
 0x320   : > { %v1673_v21 = vpop.f32.mrf.mxu2  ;;  %v2050_v50 = vadd.f32 %v4404_v40, %v4452_v18 }
 0x321   : > { %v2194_v1 = vmax.f32 %v2124_v52, 0.0  ;;  %v1762_v55 = vpop.f32.mrf.mxu3  ;;  %2162 = vmatmul.bf16.gmra.mxu1 %v1869_v23  ;;  %v1674_v12 = vadd.f32 %v1673_v21, %v4327_v7  ;;  %v1597_v52 = vadd.f32 %v4365_v10, %v1508_v54 }
 0x323   : > { %2226 = vst [vmem:[%s4411_s23 + $0x30] sm:$0xff] %v2194_v1  ;;  %v1763_v8 = vadd.f32 %v1762_v55, %v1674_v12 }
 0x325   : > { %v1831_v11 = vmax.f32 %v1763_v8, 0.0 }
 0x326   : > { %v2125_v63 = vpop.f32.mrf.mxu1 }
 0x327   : > { %v2126_v2 = vadd.f32 %v2125_v63, %v2037_v30  ;;  %v2059_v63 = vpop.f32.mrf.mxu0 }
 0x328   : > { %v1675_v28 = vpop.f32.mrf.mxu2 }
 0x329   : > { %v2195_v35 = vmax.f32 %v2126_v2, 0.0  ;;  %v1676_v39 = vadd.f32 %v1675_v28, %v1587_v33  ;;  %v1764_v49 = vpop.f32.mrf.mxu3 }
 0x32b   : > { %2227 = vst [vmem:[%s4411_s23 + $0x38] sm:$0xff] %v2195_v35  ;;  %v1765_v62 = vadd.f32 %v1764_v49, %v1676_v39  ;;  %v1513_v39 = vadd.f32 %v4315_v24, %v4103_v47  ;;  %v2052_v49 = vadd.f32 %v4404_v40, %v2051_v57  ;;  %v2055_v47 = vadd.f32 %v4404_v40, %v2054_v31 }
 0x32c   : > { %v2060_v31 = vadd.f32 %v4404_v40, %v2059_v63 }
 0x32d   : > { %v1833_v3 = vmax.f32 %v1765_v62, 0.0 }
 0x32e   : > { %v2128_v32 = vpop.f32.mrf.mxu1 }
 0x32f   : > { %v1871_v7 = vpack.c.bf16 %v1833_v3, %v1831_v11  ;;  %v2129_v58 = vadd.f32 %v2128_v32, %v2040_v26  ;;  %v2061_v26 = vpop.f32.mrf.mxu0  ;;  %v1602_v11 = vadd.f32 %v4398_v16, %v1513_v39 }
 0x330   : > { %v1678_v14 = vpop.f32.mrf.mxu2 }
 0x331   : > { %v2196_v20 = vmax.f32 %v2129_v58, 0.0  ;;  %v1767_v27 = vpop.f32.mrf.mxu3  ;;  %2167 = vmatmul.bf16.gmra.mxu1 %v1871_v7  ;;  %v1679_v53 = vadd.f32 %v1678_v14, %v4340_v56 }
 0x333   : > { %2228 = vst [vmem:[%s4411_s23 + $0x40] sm:$0xff] %v2196_v20  ;;  %v1768_v59 = vadd.f32 %v1767_v27, %v1679_v53 }
 0x335   : > { %v1835_v41 = vmax.f32 %v1768_v59, 0.0 }
 0x336   : > { %v2130_v36 = vpop.f32.mrf.mxu1 }
 0x337   : > { %v2131_v46 = vadd.f32 %v2130_v36, %v2042_v6  ;;  %v2064_v53 = vpop.f32.mrf.mxu0  ;;  %v2057_v36 = vadd.f32 %v4404_v40, %v2056_v9 }
 0x338   : > { %v1680_v17 = vpop.f32.mrf.mxu2 }
 0x339   : > { %v2197_v19 = vmax.f32 %v2131_v46, 0.0  ;;  %v1681_v15 = vadd.f32 %v1680_v17, %v1592_v44  ;;  %v1769_v51 = vpop.f32.mrf.mxu3 }
 0x33b   : > { %2229 = vst [vmem:[%s4411_s23 + $0x48] sm:$0xff] %v2197_v19  ;;  %v1770_v43 = vadd.f32 %v1769_v51, %v1681_v15 }
 0x33d   : > { %v1837_v48 = vmax.f32 %v1770_v43, 0.0 }
 0x33e   : > { %v2133_v61 = vpop.f32.mrf.mxu1 }
 0x33f   : > { %v1873_v56 = vpack.c.bf16 %v1837_v48, %v1835_v41  ;;  %v2134_v60 = vadd.f32 %v2133_v61, %v2045_v45  ;;  %v2066_v59 = vpop.f32.mrf.mxu0  ;;  %v2062_v45 = vadd.f32 %v4404_v40, %v2061_v26 }
 0x340   : > { %v1683_v34 = vpop.f32.mrf.mxu2  ;;  %v2067_v9 = vadd.f32 %v4404_v40, %v2066_v59 }
 0x341   : > { %v2198_v4 = vmax.f32 %v2134_v60, 0.0  ;;  %v1772_v29 = vpop.f32.mrf.mxu3  ;;  %2172 = vmatmul.bf16.gmra.mxu1 %v1873_v56  ;;  %v1684_v42 = vadd.f32 %v1683_v34, %v4358_v5  ;;  %v2065_v56 = vadd.f32 %v4404_v40, %v2064_v53 }
 0x343   : > { %2230 = vst [vmem:[%s4411_s23 + $0x50] sm:$0xff] %v2198_v4  ;;  %v1773_v55 = vadd.f32 %v1772_v29, %v1684_v42 }
 0x345   : > { %v1839_v33 = vmax.f32 %v1773_v55, 0.0 }
 0x346   : > { %v2135_v23 = vpop.f32.mrf.mxu1 }
 0x347   : > { %v2136_v21 = vadd.f32 %v2135_v23, %v2047_v38  ;;  %v2069_v43 = vpop.f32.mrf.mxu0 }
 0x348   : > { %v1685_v1 = vpop.f32.mrf.mxu2 }
 0x349   : > { %v2199_v25 = vmax.f32 %v2136_v21, 0.0  ;;  %v1686_v0 = vadd.f32 %v1685_v1, %v1597_v52  ;;  %v1774_v30 = vpop.f32.mrf.mxu3  ;;  %v2070_v52 = vadd.f32 %v4404_v40, %v2069_v43 }
 0x34b   : > { %2231 = vst [vmem:[%s4411_s23 + $0x58] sm:$0xff] %v2199_v25  ;;  %v1775_v12 = vadd.f32 %v1774_v30, %v1686_v0 }
 0x34d   : > { %v1841_v22 = vmax.f32 %v1775_v12, 0.0 }
 0x34e   : > { %v2138_v2 = vpop.f32.mrf.mxu1 }
 0x34f   : > { %v1875_v5 = vpack.c.bf16 %v1841_v22, %v1839_v33  ;;  %v2139_v28 = vadd.f32 %v2138_v2, %v2050_v50  ;;  %v2071_v60 = vpop.f32.mrf.mxu0 }
 0x350   : > { %v1688_v8 = vpop.f32.mrf.mxu2  ;;  %v2072_v0 = vadd.f32 %v4404_v40, %v2071_v60 }
 0x351   : > { %v2200_v10 = vmax.f32 %v2139_v28, 0.0  ;;  %v1777_v35 = vpop.f32.mrf.mxu3  ;;  %2177 = vmatmul.bf16.gmra.mxu1 %v1875_v5  ;;  %v1689_v62 = vadd.f32 %v1688_v8, %v4373_v37 }
 0x353   : > { %2232 = vst [vmem:[%s4411_s23 + $0x60] sm:$0xff] %v2200_v10  ;;  %v1778_v7 = vadd.f32 %v1777_v35, %v1689_v62 }
 0x355   : > { %v1843_v24 = vmax.f32 %v1778_v7, 0.0 }
 0x356   : > { %v2140_v18 = vpop.f32.mrf.mxu1 }
 0x357   : > { %v2141_v3 = vadd.f32 %v2140_v18, %v2052_v49  ;;  %v2074_v42 = vpop.f32.mrf.mxu0 }
 0x358   : > { %v1690_v32 = vpop.f32.mrf.mxu2  ;;  %v2075_v33 = vadd.f32 %v4404_v40, %v2074_v42 }
 0x359   : > { %v2201_v58 = vmax.f32 %v2141_v3, 0.0  ;;  %v1691_v14 = vadd.f32 %v1690_v32, %v1602_v11  ;;  %v1779_v20 = vpop.f32.mrf.mxu3 }
 0x35b   : > { %2233 = vst [vmem:[%s4411_s23 + $0x68] sm:$0xff] %v2201_v58  ;;  %v1780_v27 = vadd.f32 %v1779_v20, %v1691_v14 }
 0x35d   : > { %v1845_v57 = vmax.f32 %v1780_v27, 0.0 }
 0x35e   : > { %v2143_v13 = vpop.f32.mrf.mxu1 }
 0x35f   : > { %v1877_v37 = vpack.c.bf16 %v1845_v57, %v1843_v24  ;;  %v2144_v6 = vadd.f32 %v2143_v13, %v2055_v47  ;;  %v2076_v25 = vpop.f32.mrf.mxu0 }
 0x360   : > { %v2077_v28 = vadd.f32 %v4404_v40, %v2076_v25 }
 0x361   : > { %v2202_v16 = vmax.f32 %v2144_v6, 0.0  ;;  %2182 = vmatmul.bf16.gmra.mxu1 %v1877_v37 }
 0x363   : > { %2234 = vst [vmem:[%s4411_s23 + $0x70] sm:$0xff] %v2202_v16 }
 0x366   : > { %v2145_v44 = vpop.f32.mrf.mxu1 }
 0x367   : > { %v2146_v46 = vadd.f32 %v2145_v44, %v2057_v36  ;;  %v2079_v50 = vpop.f32.mrf.mxu0 }
 0x368   : > { %v2080_v49 = vadd.f32 %v4404_v40, %v2079_v50 }
 0x369   : > { %v2203_v17 = vmax.f32 %v2146_v46, 0.0 }
 0x36b   : > { %2235 = vst [vmem:[%s4411_s23 + $0x78] sm:$0xff] %v2203_v17 }
 0x36e   : > { %v2148_v19 = vpop.f32.mrf.mxu1 }
 0x36f   : > { %v2149_v15 = vadd.f32 %v2148_v19, %v2060_v31  ;;  %v2081_v8 = vpop.f32.mrf.mxu0 }
 0x370   : > { %v2082_v3 = vadd.f32 %v4404_v40, %v2081_v8 }
 0x371   : > { %v2204_v51 = vmax.f32 %v2149_v15, 0.0 }
 0x373   : > { %2236 = vst [vmem:[%s4411_s23 + $0x80] sm:$0xff] %v2204_v51 }
 0x376   : > { %v2150_v41 = vpop.f32.mrf.mxu1 }
 0x377   : > { %v2151_v48 = vadd.f32 %v2150_v41, %v2062_v45  ;;  %v2084_v18 = vpop.f32.mrf.mxu0 }
 0x378   : > { %v2085_v20 = vadd.f32 %v4404_v40, %v2084_v18 }
 0x379   : > { %v2205_v61 = vmax.f32 %v2151_v48, 0.0 }
 0x37b   : > { %2237 = vst [vmem:[%s4411_s23 + $0x88] sm:$0xff] %v2205_v61 }
 0x37e   : > { %v2153_v34 = vpop.f32.mrf.mxu1 }
 0x37f   : > { %v2154_v4 = vadd.f32 %v2153_v34, %v2065_v56  ;;  %v2086_v14 = vpop.f32.mrf.mxu0 }
 0x380   : > { %v2087_v13 = vadd.f32 %v4404_v40, %v2086_v14 }
 0x381   : > { %v2206_v29 = vmax.f32 %v2154_v4, 0.0 }
 0x383   : > { %2238 = vst [vmem:[%s4411_s23 + $0x90] sm:$0xff] %v2206_v29 }
 0x386   : > { %v2155_v54 = vpop.f32.mrf.mxu1 }
 0x387   : > { %v2156_v38 = vadd.f32 %v2155_v54, %v2067_v9  ;;  %v2089_v57 = vpop.f32.mrf.mxu0 }
 0x388   : > { %v2090_v16 = vadd.f32 %v4404_v40, %v2089_v57 }
 0x389   : > { %v2207_v23 = vmax.f32 %v2156_v38, 0.0 }
 0x38b   : > { %2239 = vst [vmem:[%s4411_s23 + $0x98] sm:$0xff] %v2207_v23 }
 0x38e   : > { %v2158_v21 = vpop.f32.mrf.mxu1 }
 0x38f   : > { %v2159_v1 = vadd.f32 %v2158_v21, %v2070_v52  ;;  %v2091_v36 = vpop.f32.mrf.mxu0 }
 0x390   : > { %v2092_v59 = vadd.f32 %v4404_v40, %v2091_v36 }
 0x391   : > { %v2208_v55 = vmax.f32 %v2159_v1, 0.0 }
 0x393   : > { %2240 = vst [vmem:[%s4411_s23 + $0xa0] sm:$0xff] %v2208_v55 }
 0x396   : > { %v2160_v30 = vpop.f32.mrf.mxu1 }
 0x397   : > { %v2161_v12 = vadd.f32 %v2160_v30, %v2072_v0  ;;  %v2094_v15 = vpop.f32.mrf.mxu0 }
 0x398   : > { %v2095_v43 = vadd.f32 %v4404_v40, %v2094_v15 }
 0x399   : > { %v2209_v63 = vmax.f32 %v2161_v12, 0.0 }
 0x39b   : > { %2241 = vst [vmem:[%s4411_s23 + $0xa8] sm:$0xff] %v2209_v63 }
 0x39e   : > { %v2163_v22 = vpop.f32.mrf.mxu1 }
 0x39f   : > { %v2164_v2 = vadd.f32 %v2163_v22, %v2075_v33  ;;  %v2096_v61 = vpop.f32.mrf.mxu0 }
 0x3a0   : > { %v2097_v56 = vadd.f32 %v4404_v40, %v2096_v61 }
 0x3a1   : > { %v2210_v5 = vmax.f32 %v2164_v2, 0.0 }
 0x3a3   : > { %2242 = vst [vmem:[%s4411_s23 + $0xb0] sm:$0xff] %v2210_v5 }
 0x3a6   : > { %v2165_v10 = vpop.f32.mrf.mxu1 }
 0x3a7   : > { %v2166_v35 = vadd.f32 %v2165_v10, %v2077_v28 }
 0x3a9   : > { %v2211_v39 = vmax.f32 %v2166_v35, 0.0 }
 0x3ab   : > { %2243 = vst [vmem:[%s4411_s23 + $0xb8] sm:$0xff] %v2211_v39 }
 0x3ae   : > { %v2168_v62 = vpop.f32.mrf.mxu1 }
 0x3af   : > { %v2169_v26 = vadd.f32 %v2168_v62, %v2080_v49 }
 0x3b1   : > { %v2212_v11 = vmax.f32 %v2169_v26, 0.0 }
 0x3b3   : > { %2244 = vst [vmem:[%s4411_s23 + $0xc0] sm:$0xff] %v2212_v11 }
 0x3b6   : > { %v2170_v32 = vpop.f32.mrf.mxu1 }
 0x3b7   : > { %v2171_v7 = vadd.f32 %v2170_v32, %v2082_v3 }
 0x3b9   : > { %v2213_v58 = vmax.f32 %v2171_v7, 0.0 }
 0x3bb   : > { %2245 = vst [vmem:[%s4411_s23 + $0xc8] sm:$0xff] %v2213_v58 }
 0x3be   : > { %v2173_v27 = vpop.f32.mrf.mxu1 }
 0x3bf   : > { %v2174_v47 = vadd.f32 %v2173_v27, %v2085_v20 }
 0x3c1   : > { %v2214_v24 = vmax.f32 %v2174_v47, 0.0 }
 0x3c3   : > { %2246 = vst [vmem:[%s4411_s23 + $0xd0] sm:$0xff] %v2214_v24 }
 0x3c6   : > { %v2175_v37 = vpop.f32.mrf.mxu1 }
 0x3c7   : > { %v2176_v6 = vadd.f32 %v2175_v37, %v2087_v13 }
 0x3c9   : > { %v2215_v53 = vmax.f32 %v2176_v6, 0.0 }
 0x3cb   : > { %2247 = vst [vmem:[%s4411_s23 + $0xd8] sm:$0xff] %v2215_v53 }
 0x3ce   : > { %v2178_v44 = vpop.f32.mrf.mxu1 }
 0x3cf   : > { %v2179_v46 = vadd.f32 %v2178_v44, %v2090_v16 }
 0x3d1   : > { %v2216_v17 = vmax.f32 %v2179_v46, 0.0 }
 0x3d3   : > { %2248 = vst [vmem:[%s4411_s23 + $0xe0] sm:$0xff] %v2216_v17 }
 0x3d6   : > { %v2180_v31 = vpop.f32.mrf.mxu1 }
 0x3d7   : > { %v2181_v19 = vadd.f32 %v2180_v31, %v2092_v59 }
 0x3d9   : > { %v2217_v51 = vmax.f32 %v2181_v19, 0.0 }
 0x3db   : > { %2249 = vst [vmem:[%s4411_s23 + $0xe8] sm:$0xff] %v2217_v51 }
 0x3de   : > { %v2183_v45 = vpop.f32.mrf.mxu1 }
 0x3df   : > { %v2184_v41 = vadd.f32 %v2183_v45, %v2095_v43 }
 0x3e1   : > { %v2218_v48 = vmax.f32 %v2184_v41, 0.0 }
 0x3e3   : > { %2250 = vst [vmem:[%s4411_s23 + $0xf0] sm:$0xff] %v2218_v48 }
 0x3e6   : > { %v2185_v60 = vpop.f32.mrf.mxu1 }
 0x3e7   : > { %v2186_v34 = vadd.f32 %v2185_v60, %v2097_v56 }
 0x3e9   : > { %v2219_v4 = vmax.f32 %v2186_v34, 0.0 }
 0x3eb   : > { %2251 = vst [vmem:[%s4411_s23 + $0xf8] sm:$0xff] %v2219_v4 }
 0x3ec   : > { %3363 = shalt.err (!%p3360_p10)
}
 0x3ed   : > { %s3421_s17 = smov 128   ;;  %s3422_s16 = smov 8  }
 0x3ee   : > { %3144 = dma.vmem_to_hbm [thread:$0]  (%p3536_p7), %s2266_s13, 4096, %s2268_s14, %s2253_s7, %s3421_s17, %s3421_s17, %s3422_s16  }
 0x3ef PF: > { %s2282_s23 = sand.u32 1, %s3398_s18   ;;  %p4666_p12 = scmp.ge.s32.totalorder %s3410_s21, 2 }
 0x3f0   : > { %s2283_s26 = scalar_lea.sflag [#allocation4], %s2282_s23 }
 0x3f1   : > { %p3161_p13 = pnand %p4666_p12, %p3488_p6 }
 0x3f3   : > { %p3162_p0 = pneg %p3161_p13 }
 0x3f5   : > { %3393 = dma.done.wait (%p3162_p0), %s2283_s26, 4096  }
 0x3f6   : > { %3395 = vsyncadd (%p3162_p0), %s2283_s26, 4294963200  ;;  %p20_p3 = scmp.ge.s32.totalorder %s3522_s30, 4   ;;  %s4667_s18 = smov %s3402_s19 }
 0x3f7   : > { %s4668_s19 = smov %s3406_s20  ;;  %s4669_s20 = smov %s3532_s9 }
 0x3f8   : > { %s4670_s21 = smov %s3522_s30  ;;  %22 = sbr.rel (!%p20_p3) target bundleno = 7 (0x7), region = 97 }
 0x3fd   :  { %2289 = vsyncpa [#allocation3], 1 }
 0x3fe   :  { %2291 = vsyncpa [#allocation3 + $0x1], 1 }
 0x3ff   :  { %2292 = vsyncpa [#allocation6], 1 }
 0x400   :  { %2293 = vsyncpa [#allocation9], 1 }
 0x401   :  { %2294 = vsyncpa [#allocation4], 1 }
 0x402   :  { %2296 = vsyncpa [#allocation4 + $0x1], 1 }

</bundles_post_ra>
